<compile_context>
chip_gen: v6e
topology: v6e:2x2x1
jax: 0.10.0
libtpu: 0.0.40
codegen_flags: <defaults>
</compile_context>

<pallas_src>
import math
import numpy as np
import jax
import jax.numpy as jnp
from jax.experimental import pallas as pl
from jax.experimental.pallas import tpu as pltpu


# ----------------------------------------------------------------------------
# Bilinear "resize_patches_to_image" as a precomputed (P, H*W) interpolation
# matrix (PyTorch bilinear, align_corners=False).  Applied inside the decoder
# kernel as a fused matmul.
# ----------------------------------------------------------------------------
def _bilinear_1d_matrix(in_size, out_size):
    scale = in_size / out_size
    w = np.zeros((out_size, in_size), dtype=np.float32)
    for i in range(out_size):
        src = (i + 0.5) * scale - 0.5
        src = max(src, 0.0)                     # torch clamps negative src to 0
        i0 = min(int(math.floor(src)), in_size - 1)
        i1 = min(i0 + 1, in_size - 1)
        lam = src - i0
        w[i, i0] += 1.0 - lam
        w[i, i1] += lam
    return w


def _bilinear_kernel_matrix(grid_h, grid_w, out_h, out_w):
    wh = _bilinear_1d_matrix(grid_h, out_h)     # (out_h, grid_h)
    ww = _bilinear_1d_matrix(grid_w, out_w)     # (out_w, grid_w)
    # patch index p = ph*grid_w + pw ; output pixel index = i*out_w + j
    k = np.einsum("ip,jq->pqij", wh, ww).reshape(grid_h * grid_w, out_h * out_w)
    return k.astype(np.float32)


# ----------------------------------------------------------------------------
# Fused decoder kernel (one grid step = TG groups = TG*K z-rows):
#   layer0 (hoisted, p-invariant) -> broadcast tokens into rows -> MLP ->
#   slot softmax (on a lane-dense (TG,K,P) layout) -> weighted reconstruction
#   (stored lane-dense as (TG, P*S)), masks, and fused bilinear image resize.
# ----------------------------------------------------------------------------
def _make_decoder_kernel(num_linear, tg, k_slots, p_tokens, stoch_dim):
    K, P, S = k_slots, p_tokens, stoch_dim
    TM = tg * K

    def kernel(*refs):
        z_ref = refs[0]                         # (TM, D_in)   z rows of this tile
        pos_ref = refs[1]                       # (P, D_in)    learned positional embedding
        wb = refs[2:2 + 2 * num_linear]         # W0, b0, W1, b1, ...
        kmat_ref = refs[2 + 2 * num_linear]     # (P, HW)      bilinear resize matrix
        recon_ref = refs[3 + 2 * num_linear]    # (TG, P*S)    lane-dense recon output
        masks_ref = refs[4 + 2 * num_linear]    # (TM, P)
        img_ref = refs[5 + 2 * num_linear]      # (TM, HW)

        w0 = wb[0][...]
        b0 = wb[1][...]
        # Hoisted p-invariant layer 0:  (z + pos) @ W0 + b0 == z@W0 + (pos@W0 + b0).
        zw0 = jnp.dot(z_ref[...], w0, preferred_element_type=jnp.float32)           # (TM, H0)
        pw0 = jnp.dot(pos_ref[...], w0, preferred_element_type=jnp.float32) + b0    # (P, H0)
        h0 = pw0.shape[-1]
        # Broadcast tokens into the row dimension: rows ordered (group, slot, token).
        x = (zw0[:, None, :] + pw0[None, :, :]).reshape(TM * P, h0)
        if num_linear > 1:
            x = jnp.maximum(x, 0.0)             # ReLU (layer 0 is a hidden layer)
        for i in range(1, num_linear):
            w = wb[2 * i][...]
            b = wb[2 * i + 1][...]
            x = jnp.dot(x, w, preferred_element_type=jnp.float32) + b
            if i < num_linear - 1:
                x = jnp.maximum(x, 0.0)         # ReLU on hidden layers only

        # (TM*P, S+1) -> (TG, K, P, S+1): leading-dim split only (free).
        out4 = x.reshape(tg, K, P, S + 1)
        dec4 = out4[..., :S]                    # (TG, K, P, S)
        logit = out4[..., S]                    # (TG, K, P)  -- P on the lane axis

        # Slot softmax over K on (TG, K, P): pure VPU/EUP work with 16 useful lanes
        # per vreg instead of 1 (no (...,1) tensors carried through the K loops).
        m = logit[:, 0]
        for kk in range(1, K):
            m = jnp.maximum(m, logit[:, kk])
        e = jnp.exp(logit - m[:, None, :])      # (TG, K, P)
        den = e[:, 0]
        for kk in range(1, K):
            den = den + e[:, kk]
        alpha = e / den[:, None, :]             # (TG, K, P)

        # Weighted reconstruction: sum over slots; alpha re-broadcast only here.
        rec = dec4[:, 0] * alpha[:, 0][..., None]
        for kk in range(1, K):
            rec = rec + dec4[:, kk] * alpha[:, kk][..., None]    # (TG, P, S)
        # Lane-dense store: (TG, P, S) -> (TG, P*S) so the recon write is unmasked.
        recon_ref[...] = rec.reshape(tg, P * S)

        # masks in torch layout (rows = flattened (B,L,K), lanes = P tokens).
        alpha_rows = alpha.reshape(TM, P)
        masks_ref[...] = alpha_rows
        # Fused bilinear resize: (TM, P) @ (P, HW) -> 4096-lane, fully unmasked stores.
        img_ref[...] = jnp.dot(alpha_rows, kmat_ref[...],
                               preferred_element_type=jnp.float32)

    return kernel


# ----------------------------------------------------------------------------
# Generation-aware tiling / VMEM budgeting.
# ----------------------------------------------------------------------------
def _tpu_vmem_capacity_bytes():
    try:
        info = pltpu.get_tpu_info()
        cap = getattr(info, "vmem_capacity_bytes", None)
        if cap:
            return int(cap)
    except Exception:
        pass
    return 64 << 20      # conservative default (v7x-class)


def _vmem_bytes_estimate(tg, K, P, dims, hw):
    """Rough per-step VMEM need (double-buffered blocks + MLP intermediates)."""
    tm = tg * K
    rows = tm * P
    maxw = max(dims)
    n_layers = len(dims) - 1
    resident = (P * dims[0]
                + sum(dims[i] * dims[i + 1] + dims[i + 1] for i in range(n_layers))
                + P * hw)
    est = 4 * (
        2 * tm * dims[0]                 # z input block (double-buffered)
        + 2 * resident                   # resident params / kmat (double-buffered)
        + 2 * tm * hw                    # image output block (double-buffered)
        + 2 * tg * P * (dims[-1] - 1)    # recon output block
        + 2 * tm * P                     # masks output block
        + 4 * rows * maxw                # MLP intermediates + softmax-tail temps
    )
    return est


def _choose_tiling(G, K, P, dims, hw):
    """Pick the group-tile size TG and an explicit vmem_limit_bytes.

    Generation aware: 128 MiB-class chips (v5e/v6e) get larger image tiles
    (amortize the ~0.35 us per-step overhead), 64 MiB-class chips (v7x) cap at
    ~8 MiB image blocks and ~48 MiB scoped VMEM.  Whenever there are >= 2
    groups we keep >= 2 grid tiles so the "parallel" axis can be split across
    v7x's two TensorCores.
    """
    cap = _tpu_vmem_capacity_bytes()
    if cap >= (100 << 20):               # v5e / v6e class (128 MiB physical VMEM)
        img_cap, row_cap = 16 << 20, 8192
        vmem_limit = min(100 << 20, cap - (8 << 20))
    else:                                # v7x class (64 MiB physical) or unknown
        img_cap, row_cap = 8 << 20, 4096
        vmem_limit = max(min(48 << 20, cap - (16 << 20)), 16 << 20)
    budget = int(0.75 * vmem_limit)

    candidates = []
    for tg in range(1, G + 1):
        if G % tg:
            continue
        if G >= 2 and (G // tg) < 2:     # keep >= 2 tiles for megacore sharding
            continue
        tm = tg * K
        if tm * P > row_cap:
            continue
        if tm * hw * 4 > img_cap:
            continue
        if _vmem_bytes_estimate(tg, K, P, dims, hw) > budget:
            continue
        candidates.append(tg)
    if not candidates:
        candidates = [1]
    aligned = [tg for tg in candidates if (tg * K) % 8 == 0]   # sublane-aligned rows
    tg = max(aligned) if aligned else max(candidates)
    return tg, int(vmem_limit)


# ----------------------------------------------------------------------------
# Wrapper
# ----------------------------------------------------------------------------
def spatial_broadcast_mlp_decoder(z, pos_embed, weights, *, grid_hw, image_size=64):
    """z: (B, L, K_slots, D_in); pos_embed: (P, D_in); weights: [(W(in,out), b(1,out)), ...]."""
    init_shape = z.shape[:-1]
    D_in = z.shape[-1]
    K_slots = init_shape[-1]
    M = int(np.prod(init_shape))
    G = M // K_slots
    P = pos_embed.shape[0]
    S = weights[-1][0].shape[1] - 1
    num_linear = len(weights)
    HW = image_size * image_size
    dims = [D_in] + [w.shape[1] for w, _ in weights]

    TG, vmem_limit = _choose_tiling(G, K_slots, P, dims, HW)
    TM = TG * K_slots
    n_tiles = G // TG

    # (n_tiles, TM, D_in): leading-dim reshape only, so every block below equals the
    # full trailing dims of its array -> no (8,128) divisibility constraints on TM/TG.
    zf = z.reshape(n_tiles, TM, D_in).astype(jnp.float32)
    pos2 = pos_embed.astype(jnp.float32)
    kmat = jnp.asarray(_bilinear_kernel_matrix(*grid_hw, image_size, image_size))

    flat_params = []
    in_specs = [
        pl.BlockSpec((None, TM, D_in), lambda g: (g, 0, 0)),   # z tile (grid over groups)
        pl.BlockSpec((P, D_in), lambda g: (0, 0)),             # positional embedding (resident)
    ]
    for w, b in weights:
        flat_params.append(w.astype(jnp.float32))
        flat_params.append(b.astype(jnp.float32))
        in_specs.append(pl.BlockSpec(w.shape, lambda g: (0, 0)))   # resident
        in_specs.append(pl.BlockSpec(b.shape, lambda g: (0, 0)))   # resident
    in_specs.append(pl.BlockSpec((P, HW), lambda g: (0, 0)))       # resize matrix (resident)

    out_specs = [
        pl.BlockSpec((None, TG, P * S), lambda g: (g, 0, 0)),      # recon, lane-dense (P*S=128)
        pl.BlockSpec((None, TM, P), lambda g: (g, 0, 0)),          # masks
        pl.BlockSpec((None, TM, HW), lambda g: (g, 0, 0)),         # masks_as_image (4096-lane)
    ]
    out_shape = [
        jax.ShapeDtypeStruct((n_tiles, TG, P * S), jnp.float32),
        jax.ShapeDtypeStruct((n_tiles, TM, P), jnp.float32),
        jax.ShapeDtypeStruct((n_tiles, TM, HW), jnp.float32),
    ]

    # Advisory cost estimate (helps XLA overlap surrounding ops).
    flops = 2 * (M + P) * dims[0] * dims[1]
    for i in range(1, num_linear):
        flops += 2 * M * P * dims[i] * dims[i + 1]
    flops += 2 * M * P * HW
    bytes_accessed = 4 * (M * D_in + P * D_in
                          + sum(w.size + b.size for w, b in weights)
                          + P * HW + G * P * S + M * P + M * HW)
    cost = pl.CostEstimate(flops=int(flops), transcendentals=int(M * P),
                           bytes_accessed=int(bytes_accessed))

    recon_t, masks_t, img_t = pl.pallas_call(
        _make_decoder_kernel(num_linear, TG, K_slots, P, S),
        grid=(n_tiles,),
        in_specs=in_specs,
        out_specs=out_specs,
        out_shape=out_shape,
        compiler_params=pltpu.CompilerParams(
            dimension_semantics=("parallel",),
            vmem_limit_bytes=vmem_limit),
        cost_estimate=cost,
    )(zf, pos2, *flat_params, kmat)

    # Only leading-dim / lane-split reshapes left (no transposes, no HBM round trips).
    reconstruction = recon_t.reshape(*init_shape[:-1], P, S)
    masks = masks_t.reshape(*init_shape, P)
    masks_as_image = img_t.reshape(*init_shape, image_size, image_size)
    return reconstruction, masks, masks_as_image


# ----------------------------------------------------------------------------
# Pure-JAX reference (mirrors the torch forward, '1d' positional embedding)
# ----------------------------------------------------------------------------
def reference_forward(z, pos_embed, weights, kmat, image_size):
    init_shape = z.shape[:-1]
    zf = z.reshape(-1, z.shape[-1])
    x = zf[:, None, :] + pos_embed[None, :, :]
    n = len(weights)
    for i, (w, b) in enumerate(weights):
        x = jnp.dot(x, w, precision=jax.lax.Precision.HIGHEST) + b.reshape(1, 1, -1)
        if i < n - 1:
            x = jnp.maximum(x, 0.0)
    S = weights[-1][0].shape[1] - 1
    out = x.reshape(*init_shape, x.shape[-2], S + 1)
    dec = out[..., :S]
    alpha = jax.nn.softmax(out[..., S:], axis=-3)
    recon = jnp.sum(dec * alpha, axis=-3)
    masks = alpha[..., 0]
    img = jnp.dot(masks.reshape(-1, masks.shape[-1]), kmat,
                  precision=jax.lax.Precision.HIGHEST)
    img = img.reshape(*init_shape, image_size, image_size)
    return recon, masks, img


if __name__ == "__main__":
    # Module hyper-parameters (small, consistent with the torch module).
    dec_input_dim = 32
    dec_hidden_layers = [64, 64]
    stoch_num_classes = 16          # token grid 4x4
    stoch_dim = 8
    grid_hw = (4, 4)
    image_size = 64
    B, L, K_slots = 2, 2, 4         # init_shape = (B, L, K_slots)

    key = jax.random.PRNGKey(0)
    dims = [dec_input_dim] + dec_hidden_layers + [stoch_dim + 1]
    keys = jax.random.split(key, 2 + (len(dims) - 1))

    # Deterministic parameter init (bias zeros, as in nn.init.zeros_).
    pos_embed = 0.02 * jax.random.normal(keys[0], (stoch_num_classes, dec_input_dim), jnp.float32)
    weights = []
    for i in range(len(dims) - 1):
        w = jax.random.normal(keys[1 + i], (dims[i], dims[i + 1]), jnp.float32) / math.sqrt(dims[i])
        b = jnp.zeros((1, dims[i + 1]), jnp.float32)
        weights.append((w, b))

    z = jax.random.normal(keys[-1], (B, L, K_slots, dec_input_dim), jnp.float32)

    recon, masks, masks_img = spatial_broadcast_mlp_decoder(
        z, pos_embed, weights, grid_hw=grid_hw, image_size=image_size)
    jax.block_until_ready((recon, masks, masks_img))

    # Validate against pure-JAX reference.
    kmat = jnp.asarray(_bilinear_kernel_matrix(*grid_hw, image_size, image_size))
    r_ref, m_ref, img_ref = reference_forward(z, pos_embed, weights, kmat, image_size)

    assert recon.shape == (B, L, stoch_num_classes, stoch_dim)
    assert masks.shape == (B, L, K_slots, stoch_num_classes)
    assert masks_img.shape == (B, L, K_slots, image_size, image_size)
    # 1e-4 tolerance: the hoisted layer-0 (z@W0 + pos@W0) reassociates f32 sums.
    np.testing.assert_allclose(np.asarray(recon), np.asarray(r_ref), rtol=1e-4, atol=1e-4)
    np.testing.assert_allclose(np.asarray(masks), np.asarray(m_ref), rtol=1e-4, atol=1e-4)
    np.testing.assert_allclose(np.asarray(masks_img), np.asarray(img_ref), rtol=1e-4, atol=1e-4)

    print("KERNEL_OK")
</pallas_src>

<mosaic_0001>
module attributes {stable_mosaic.version = 11 : i64} {
  func.func @kernel(%arg0: i32, %arg1: memref<1x8x32xf32, #tpu.memory_space<vmem>>, %arg2: memref<16x32xf32, #tpu.memory_space<vmem>>, %arg3: memref<32x64xf32, #tpu.memory_space<vmem>>, %arg4: memref<1x64xf32, #tpu.memory_space<vmem>>, %arg5: memref<64x64xf32, #tpu.memory_space<vmem>>, %arg6: memref<1x64xf32, #tpu.memory_space<vmem>>, %arg7: memref<64x9xf32, #tpu.memory_space<vmem>>, %arg8: memref<1x9xf32, #tpu.memory_space<vmem>>, %arg9: memref<16x4096xf32, #tpu.memory_space<vmem>>, %arg10: memref<1x2x128xf32, #tpu.memory_space<vmem>>, %arg11: memref<1x8x16xf32, #tpu.memory_space<vmem>>, %arg12: memref<1x8x4096xf32, #tpu.memory_space<vmem>>) attributes {dimension_semantics = [#tpu.dimension_semantics<parallel>], iteration_bounds = array<i64: 2>, scalar_prefetch = 0 : i64, scratch_operands = 0 : i64, tpu.core_type = #tpu.core_type<tc>, window_params = [{transform_indices = @transform_0, window_bounds = array<i64: 1, 8, 32>}, {pipeline_mode = #tpu.pipeline_mode<synchronous>, transform_indices = @transform_1, window_bounds = array<i64: 16, 32>}, {pipeline_mode = #tpu.pipeline_mode<synchronous>, transform_indices = @transform_2, window_bounds = array<i64: 32, 64>}, {pipeline_mode = #tpu.pipeline_mode<synchronous>, transform_indices = @transform_3, window_bounds = array<i64: 1, 64>}, {pipeline_mode = #tpu.pipeline_mode<synchronous>, transform_indices = @transform_4, window_bounds = array<i64: 64, 64>}, {pipeline_mode = #tpu.pipeline_mode<synchronous>, transform_indices = @transform_5, window_bounds = array<i64: 1, 64>}, {pipeline_mode = #tpu.pipeline_mode<synchronous>, transform_indices = @transform_6, window_bounds = array<i64: 64, 9>}, {pipeline_mode = #tpu.pipeline_mode<synchronous>, transform_indices = @transform_7, window_bounds = array<i64: 1, 9>}, {pipeline_mode = #tpu.pipeline_mode<synchronous>, transform_indices = @transform_8, window_bounds = array<i64: 16, 4096>}, {transform_indices = @transform_9, window_bounds = array<i64: 1, 2, 128>}, {transform_indices = @transform_10, window_bounds = array<i64: 1, 8, 16>}, {transform_indices = @transform_11, window_bounds = array<i64: 1, 8, 4096>}]} {
    %c0 = arith.constant 0 : index
    %c0_0 = arith.constant 0 : index
    %0 = vector.load %arg3[%c0, %c0_0] : memref<32x64xf32, #tpu.memory_space<vmem>>, vector<32x64xf32>
    %c0_1 = arith.constant 0 : index
    %c0_2 = arith.constant 0 : index
    %1 = vector.load %arg4[%c0_1, %c0_2] : memref<1x64xf32, #tpu.memory_space<vmem>>, vector<1x64xf32>
    %c0_3 = arith.constant 0 : index
    %c0_4 = arith.constant 0 : index
    %c0_5 = arith.constant 0 : index
    %2 = vector.load %arg1[%c0_3, %c0_4, %c0_5] : memref<1x8x32xf32, #tpu.memory_space<vmem>>, vector<1x8x32xf32>
    %3 = vector.shape_cast %2 : vector<1x8x32xf32> to vector<8x32xf32>
    %cst = arith.constant dense<0.000000e+00> : vector<8x64xf32>
    %4 = tpu.matmul %3, %0, %cst {dimension_numbers = #tpu.dot_dimension_numbers<[1], [0], [0], [1], [0, 0, 1, 1], [], []>} : vector<8x32xf32>, vector<32x64xf32>, vector<8x64xf32> -> vector<8x64xf32>
    %c0_6 = arith.constant 0 : index
    %c0_7 = arith.constant 0 : index
    %5 = vector.load %arg2[%c0_6, %c0_7] : memref<16x32xf32, #tpu.memory_space<vmem>>, vector<16x32xf32>
    %cst_8 = arith.constant dense<0.000000e+00> : vector<16x64xf32>
    %6 = tpu.matmul %5, %0, %cst_8 {dimension_numbers = #tpu.dot_dimension_numbers<[1], [0], [0], [1], [0, 0, 1, 1], [], []>} : vector<16x32xf32>, vector<32x64xf32>, vector<16x64xf32> -> vector<16x64xf32>
    %7 = vector.broadcast %1 : vector<1x64xf32> to vector<16x64xf32>
    %8 = arith.addf %6, %7 : vector<16x64xf32>
    %9 = vector.shape_cast %4 : vector<8x64xf32> to vector<8x1x64xf32>
    %10 = vector.shape_cast %8 : vector<16x64xf32> to vector<1x16x64xf32>
    %11 = vector.broadcast %9 : vector<8x1x64xf32> to vector<8x16x64xf32>
    %12 = vector.broadcast %10 : vector<1x16x64xf32> to vector<8x16x64xf32>
    %13 = arith.addf %11, %12 : vector<8x16x64xf32>
    %14 = vector.shape_cast %13 : vector<8x16x64xf32> to vector<128x64xf32>
    %cst_9 = arith.constant 0.000000e+00 : f32
    %15 = vector.broadcast %cst_9 : f32 to vector<128x64xf32>
    %16 = arith.maximumf %14, %15 : vector<128x64xf32>
    %c0_10 = arith.constant 0 : index
    %c0_11 = arith.constant 0 : index
    %17 = vector.load %arg5[%c0_10, %c0_11] : memref<64x64xf32, #tpu.memory_space<vmem>>, vector<64x64xf32>
    %c0_12 = arith.constant 0 : index
    %c0_13 = arith.constant 0 : index
    %18 = vector.load %arg6[%c0_12, %c0_13] : memref<1x64xf32, #tpu.memory_space<vmem>>, vector<1x64xf32>
    %cst_14 = arith.constant dense<0.000000e+00> : vector<128x64xf32>
    %19 = tpu.matmul %16, %17, %cst_14 {dimension_numbers = #tpu.dot_dimension_numbers<[1], [0], [0], [1], [0, 0, 1, 1], [], []>} : vector<128x64xf32>, vector<64x64xf32>, vector<128x64xf32> -> vector<128x64xf32>
    %20 = vector.broadcast %18 : vector<1x64xf32> to vector<128x64xf32>
    %21 = arith.addf %19, %20 : vector<128x64xf32>
    %cst_15 = arith.constant 0.000000e+00 : f32
    %22 = vector.broadcast %cst_15 : f32 to vector<128x64xf32>
    %23 = arith.maximumf %21, %22 : vector<128x64xf32>
    %c0_16 = arith.constant 0 : index
    %c0_17 = arith.constant 0 : index
    %24 = vector.load %arg7[%c0_16, %c0_17] : memref<64x9xf32, #tpu.memory_space<vmem>>, vector<64x9xf32>
    %c0_18 = arith.constant 0 : index
    %c0_19 = arith.constant 0 : index
    %25 = vector.load %arg8[%c0_18, %c0_19] : memref<1x9xf32, #tpu.memory_space<vmem>>, vector<1x9xf32>
    %cst_20 = arith.constant dense<0.000000e+00> : vector<128x9xf32>
    %26 = tpu.matmul %23, %24, %cst_20 {dimension_numbers = #tpu.dot_dimension_numbers<[1], [0], [0], [1], [0, 0, 1, 1], [], []>} : vector<128x64xf32>, vector<64x9xf32>, vector<128x9xf32> -> vector<128x9xf32>
    %27 = vector.broadcast %25 : vector<1x9xf32> to vector<128x9xf32>
    %28 = arith.addf %26, %27 : vector<128x9xf32>
    %29 = vector.shape_cast %28 : vector<128x9xf32> to vector<2x4x16x9xf32>
    %30 = vector.extract_strided_slice %29 {offsets = [0, 0, 0, 0], sizes = [2, 4, 16, 8], strides = [1, 1, 1, 1]} : vector<2x4x16x9xf32> to vector<2x4x16x8xf32>
    %31 = vector.extract_strided_slice %29 {offsets = [0, 0, 0, 8], sizes = [2, 4, 16, 1], strides = [1, 1, 1, 1]} : vector<2x4x16x9xf32> to vector<2x4x16x1xf32>
    %32 = vector.shape_cast %31 : vector<2x4x16x1xf32> to vector<2x4x16xf32>
    %33 = vector.extract_strided_slice %32 {offsets = [0, 0, 0], sizes = [2, 1, 16], strides = [1, 1, 1]} : vector<2x4x16xf32> to vector<2x1x16xf32>
    %34 = vector.shape_cast %33 : vector<2x1x16xf32> to vector<2x16xf32>
    %35 = vector.extract_strided_slice %32 {offsets = [0, 1, 0], sizes = [2, 1, 16], strides = [1, 1, 1]} : vector<2x4x16xf32> to vector<2x1x16xf32>
    %36 = vector.shape_cast %35 : vector<2x1x16xf32> to vector<2x16xf32>
    %37 = arith.maximumf %34, %36 : vector<2x16xf32>
    %38 = vector.extract_strided_slice %32 {offsets = [0, 2, 0], sizes = [2, 1, 16], strides = [1, 1, 1]} : vector<2x4x16xf32> to vector<2x1x16xf32>
    %39 = vector.shape_cast %38 : vector<2x1x16xf32> to vector<2x16xf32>
    %40 = arith.maximumf %37, %39 : vector<2x16xf32>
    %41 = vector.extract_strided_slice %32 {offsets = [0, 3, 0], sizes = [2, 1, 16], strides = [1, 1, 1]} : vector<2x4x16xf32> to vector<2x1x16xf32>
    %42 = vector.shape_cast %41 : vector<2x1x16xf32> to vector<2x16xf32>
    %43 = arith.maximumf %40, %42 : vector<2x16xf32>
    %44 = vector.shape_cast %43 : vector<2x16xf32> to vector<2x1x16xf32>
    %45 = vector.broadcast %44 : vector<2x1x16xf32> to vector<2x4x16xf32>
    %46 = arith.subf %32, %45 : vector<2x4x16xf32>
    %47 = math.exp %46 : vector<2x4x16xf32>
    %48 = vector.extract_strided_slice %47 {offsets = [0, 0, 0], sizes = [2, 1, 16], strides = [1, 1, 1]} : vector<2x4x16xf32> to vector<2x1x16xf32>
    %49 = vector.shape_cast %48 : vector<2x1x16xf32> to vector<2x16xf32>
    %50 = vector.extract_strided_slice %47 {offsets = [0, 1, 0], sizes = [2, 1, 16], strides = [1, 1, 1]} : vector<2x4x16xf32> to vector<2x1x16xf32>
    %51 = vector.shape_cast %50 : vector<2x1x16xf32> to vector<2x16xf32>
    %52 = arith.addf %49, %51 : vector<2x16xf32>
    %53 = vector.extract_strided_slice %47 {offsets = [0, 2, 0], sizes = [2, 1, 16], strides = [1, 1, 1]} : vector<2x4x16xf32> to vector<2x1x16xf32>
    %54 = vector.shape_cast %53 : vector<2x1x16xf32> to vector<2x16xf32>
    %55 = arith.addf %52, %54 : vector<2x16xf32>
    %56 = vector.extract_strided_slice %47 {offsets = [0, 3, 0], sizes = [2, 1, 16], strides = [1, 1, 1]} : vector<2x4x16xf32> to vector<2x1x16xf32>
    %57 = vector.shape_cast %56 : vector<2x1x16xf32> to vector<2x16xf32>
    %58 = arith.addf %55, %57 : vector<2x16xf32>
    %59 = vector.shape_cast %58 : vector<2x16xf32> to vector<2x1x16xf32>
    %60 = vector.broadcast %59 : vector<2x1x16xf32> to vector<2x4x16xf32>
    %61 = arith.divf %47, %60 : vector<2x4x16xf32>
    %62 = vector.extract_strided_slice %30 {offsets = [0, 0, 0, 0], sizes = [2, 1, 16, 8], strides = [1, 1, 1, 1]} : vector<2x4x16x8xf32> to vector<2x1x16x8xf32>
    %63 = vector.shape_cast %62 : vector<2x1x16x8xf32> to vector<2x16x8xf32>
    %64 = vector.extract_strided_slice %61 {offsets = [0, 0, 0], sizes = [2, 1, 16], strides = [1, 1, 1]} : vector<2x4x16xf32> to vector<2x1x16xf32>
    %65 = vector.shape_cast %64 : vector<2x1x16xf32> to vector<2x16xf32>
    %66 = vector.shape_cast %65 : vector<2x16xf32> to vector<2x16x1xf32>
    %67 = vector.broadcast %66 : vector<2x16x1xf32> to vector<2x16x8xf32>
    %68 = arith.mulf %63, %67 : vector<2x16x8xf32>
    %69 = vector.extract_strided_slice %30 {offsets = [0, 1, 0, 0], sizes = [2, 1, 16, 8], strides = [1, 1, 1, 1]} : vector<2x4x16x8xf32> to vector<2x1x16x8xf32>
    %70 = vector.shape_cast %69 : vector<2x1x16x8xf32> to vector<2x16x8xf32>
    %71 = vector.extract_strided_slice %61 {offsets = [0, 1, 0], sizes = [2, 1, 16], strides = [1, 1, 1]} : vector<2x4x16xf32> to vector<2x1x16xf32>
    %72 = vector.shape_cast %71 : vector<2x1x16xf32> to vector<2x16xf32>
    %73 = vector.shape_cast %72 : vector<2x16xf32> to vector<2x16x1xf32>
    %74 = vector.broadcast %73 : vector<2x16x1xf32> to vector<2x16x8xf32>
    %75 = arith.mulf %70, %74 : vector<2x16x8xf32>
    %76 = arith.addf %68, %75 : vector<2x16x8xf32>
    %77 = vector.extract_strided_slice %30 {offsets = [0, 2, 0, 0], sizes = [2, 1, 16, 8], strides = [1, 1, 1, 1]} : vector<2x4x16x8xf32> to vector<2x1x16x8xf32>
    %78 = vector.shape_cast %77 : vector<2x1x16x8xf32> to vector<2x16x8xf32>
    %79 = vector.extract_strided_slice %61 {offsets = [0, 2, 0], sizes = [2, 1, 16], strides = [1, 1, 1]} : vector<2x4x16xf32> to vector<2x1x16xf32>
    %80 = vector.shape_cast %79 : vector<2x1x16xf32> to vector<2x16xf32>
    %81 = vector.shape_cast %80 : vector<2x16xf32> to vector<2x16x1xf32>
    %82 = vector.broadcast %81 : vector<2x16x1xf32> to vector<2x16x8xf32>
    %83 = arith.mulf %78, %82 : vector<2x16x8xf32>
    %84 = arith.addf %76, %83 : vector<2x16x8xf32>
    %85 = vector.extract_strided_slice %30 {offsets = [0, 3, 0, 0], sizes = [2, 1, 16, 8], strides = [1, 1, 1, 1]} : vector<2x4x16x8xf32> to vector<2x1x16x8xf32>
    %86 = vector.shape_cast %85 : vector<2x1x16x8xf32> to vector<2x16x8xf32>
    %87 = vector.extract_strided_slice %61 {offsets = [0, 3, 0], sizes = [2, 1, 16], strides = [1, 1, 1]} : vector<2x4x16xf32> to vector<2x1x16xf32>
    %88 = vector.shape_cast %87 : vector<2x1x16xf32> to vector<2x16xf32>
    %89 = vector.shape_cast %88 : vector<2x16xf32> to vector<2x16x1xf32>
    %90 = vector.broadcast %89 : vector<2x16x1xf32> to vector<2x16x8xf32>
    %91 = arith.mulf %86, %90 : vector<2x16x8xf32>
    %92 = arith.addf %84, %91 : vector<2x16x8xf32>
    %93 = vector.shape_cast %92 : vector<2x16x8xf32> to vector<2x128xf32>
    %c0_21 = arith.constant 0 : index
    %c0_22 = arith.constant 0 : index
    %c0_23 = arith.constant 0 : index
    %94 = vector.load %arg10[%c0_21, %c0_22, %c0_23] : memref<1x2x128xf32, #tpu.memory_space<vmem>>, vector<1x2x128xf32>
    %95 = vector.shape_cast %94 : vector<1x2x128xf32> to vector<2x128xf32>
    %96 = vector.shape_cast %93 : vector<2x128xf32> to vector<1x2x128xf32>
    tpu.vector_store %arg10[%c0_21, %c0_22, %c0_23], %96 {strides = array<i32>} : memref<1x2x128xf32, #tpu.memory_space<vmem>>, vector<1x2x128xf32>,
    %97 = vector.shape_cast %61 : vector<2x4x16xf32> to vector<8x16xf32>
    %c0_24 = arith.constant 0 : index
    %c0_25 = arith.constant 0 : index
    %c0_26 = arith.constant 0 : index
    %98 = vector.load %arg11[%c0_24, %c0_25, %c0_26] : memref<1x8x16xf32, #tpu.memory_space<vmem>>, vector<1x8x16xf32>
    %99 = vector.shape_cast %98 : vector<1x8x16xf32> to vector<8x16xf32>
    %100 = vector.shape_cast %97 : vector<8x16xf32> to vector<1x8x16xf32>
    tpu.vector_store %arg11[%c0_24, %c0_25, %c0_26], %100 {strides = array<i32>} : memref<1x8x16xf32, #tpu.memory_space<vmem>>, vector<1x8x16xf32>,
    %c0_27 = arith.constant 0 : index
    %c0_28 = arith.constant 0 : index
    %101 = vector.load %arg9[%c0_27, %c0_28] : memref<16x4096xf32, #tpu.memory_space<vmem>>, vector<16x4096xf32>
    %cst_29 = arith.constant dense<0.000000e+00> : vector<8x4096xf32>
    %102 = tpu.matmul %97, %101, %cst_29 {dimension_numbers = #tpu.dot_dimension_numbers<[1], [0], [0], [1], [0, 0, 1, 1], [], []>} : vector<8x16xf32>, vector<16x4096xf32>, vector<8x4096xf32> -> vector<8x4096xf32>
    %c0_30 = arith.constant 0 : index
    %c0_31 = arith.constant 0 : index
    %c0_32 = arith.constant 0 : index
    %103 = vector.load %arg12[%c0_30, %c0_31, %c0_32] : memref<1x8x4096xf32, #tpu.memory_space<vmem>>, vector<1x8x4096xf32>
    %104 = vector.shape_cast %103 : vector<1x8x4096xf32> to vector<8x4096xf32>
    %105 = vector.shape_cast %102 : vector<8x4096xf32> to vector<1x8x4096xf32>
    tpu.vector_store %arg12[%c0_30, %c0_31, %c0_32], %105 {strides = array<i32>} : memref<1x8x4096xf32, #tpu.memory_space<vmem>>, vector<1x8x4096xf32>,
    return
  }
  func.func @transform_0(%arg0: i32) -> (i32, i32, i32) {
    %c0_i32 = arith.constant 0 : i32
    %c0_i32_0 = arith.constant 0 : i32
    %c0_i32_1 = arith.constant 0 : i32
    return %arg0, %c0_i32, %c0_i32_0 : i32, i32, i32
  }
  func.func @transform_1(%arg0: i32) -> (i32, i32) {
    %c0_i32 = arith.constant 0 : i32
    %c0_i32_0 = arith.constant 0 : i32
    %c0_i32_1 = arith.constant 0 : i32
    return %c0_i32, %c0_i32_0 : i32, i32
  }
  func.func @transform_2(%arg0: i32) -> (i32, i32) {
    %c0_i32 = arith.constant 0 : i32
    %c0_i32_0 = arith.constant 0 : i32
    %c0_i32_1 = arith.constant 0 : i32
    return %c0_i32, %c0_i32_0 : i32, i32
  }
  func.func @transform_3(%arg0: i32) -> (i32, i32) {
    %c0_i32 = arith.constant 0 : i32
    %c0_i32_0 = arith.constant 0 : i32
    %c0_i32_1 = arith.constant 0 : i32
    return %c0_i32, %c0_i32_0 : i32, i32
  }
  func.func @transform_4(%arg0: i32) -> (i32, i32) {
    %c0_i32 = arith.constant 0 : i32
    %c0_i32_0 = arith.constant 0 : i32
    %c0_i32_1 = arith.constant 0 : i32
    return %c0_i32, %c0_i32_0 : i32, i32
  }
  func.func @transform_5(%arg0: i32) -> (i32, i32) {
    %c0_i32 = arith.constant 0 : i32
    %c0_i32_0 = arith.constant 0 : i32
    %c0_i32_1 = arith.constant 0 : i32
    return %c0_i32, %c0_i32_0 : i32, i32
  }
  func.func @transform_6(%arg0: i32) -> (i32, i32) {
    %c0_i32 = arith.constant 0 : i32
    %c0_i32_0 = arith.constant 0 : i32
    %c0_i32_1 = arith.constant 0 : i32
    return %c0_i32, %c0_i32_0 : i32, i32
  }
  func.func @transform_7(%arg0: i32) -> (i32, i32) {
    %c0_i32 = arith.constant 0 : i32
    %c0_i32_0 = arith.constant 0 : i32
    %c0_i32_1 = arith.constant 0 : i32
    return %c0_i32, %c0_i32_0 : i32, i32
  }
  func.func @transform_8(%arg0: i32) -> (i32, i32) {
    %c0_i32 = arith.constant 0 : i32
    %c0_i32_0 = arith.constant 0 : i32
    %c0_i32_1 = arith.constant 0 : i32
    return %c0_i32, %c0_i32_0 : i32, i32
  }
  func.func @transform_9(%arg0: i32) -> (i32, i32, i32) {
    %c0_i32 = arith.constant 0 : i32
    %c0_i32_0 = arith.constant 0 : i32
    %c0_i32_1 = arith.constant 0 : i32
    return %arg0, %c0_i32, %c0_i32_0 : i32, i32, i32
  }
  func.func @transform_10(%arg0: i32) -> (i32, i32, i32) {
    %c0_i32 = arith.constant 0 : i32
    %c0_i32_0 = arith.constant 0 : i32
    %c0_i32_1 = arith.constant 0 : i32
    return %arg0, %c0_i32, %c0_i32_0 : i32, i32, i32
  }
  func.func @transform_11(%arg0: i32) -> (i32, i32, i32) {
    %c0_i32 = arith.constant 0 : i32
    %c0_i32_0 = arith.constant 0 : i32
    %c0_i32_1 = arith.constant 0 : i32
    return %arg0, %c0_i32, %c0_i32_0 : i32, i32, i32
  }
}

</mosaic_0001>

<bundles_post_ra>
// kernel: tpu_custom_call.1
= control target key start
LH: loop header
LB: loop body
LE: loop exit
PB: predicated region body
PF: predicated region fallthrough
CT: control target
= control target key end

     0   :  { %s4407_s0 = inlined_call_operand.vmem [shape: f32[2,8,32], index: 0, kind: input, shape index: {}]   ;;  %s4408_s1 = inlined_call_operand.hbm [shape: f32[16,32], index: 1, kind: input, shape index: {}]   ;;  %s4409_s2 = inlined_call_operand.hbm [shape: f32[32,64], index: 2, kind: input, shape index: {}]   ;;  %s4410_s3 = inlined_call_operand.vmem [shape: f32[1,64], index: 3, kind: input, shape index: {}]   ;;  %s4411_s4 = inlined_call_operand.vmem [shape: f32[64,64], index: 4, kind: input, shape index: {}]   ;;  %s4412_s5 = inlined_call_operand.vmem [shape: f32[1,64], index: 5, kind: input, shape index: {}]   ;;  %s4413_s6 = inlined_call_operand.vmem [shape: f32[64,9], index: 6, kind: input, shape index: {}]   ;;  %s4414_s7 = inlined_call_operand.vmem [shape: f32[1,9], index: 7, kind: input, shape index: {}]   ;;  %s4415_s8 = inlined_call_operand.hbm [shape: f32[16,4096], index: 8, kind: input, shape index: {}]   ;;  %s4416_s9 = inlined_call_operand.hbm [shape: f32[2,2,128], index: 9, kind: output, shape index: {0}]   ;;  %s4417_s10 = inlined_call_operand.hbm [shape: f32[2,8,16], index: 10, kind: output, shape index: {1}]   ;;  %s4418_s11 = inlined_call_operand.hbm [shape: f32[2,8,4096], index: 11, kind: output, shape index: {2}]  }
   0x1   :  { %4423 = sst [smem:[#allocation18_spill]] %s4407_s0 }
   0x2   :  { %4424 = sst [smem:[#allocation19_spill]] %s4408_s1 }
   0x3   :  { %17 = vsyncpa [#allocation3], 0 }
   0x4   :  { %18 = vsyncpa [#allocation6], 0 }
   0x5   :  { %19 = vsyncpa [#allocation4], 0 }
   0x6   :  { %21 = vsyncpa [#allocation4 + $0x1], 0 }
   0x7   :  { %22 = vsyncpa [#allocation10], 0 }
   0x8   :  { %24 = vsyncpa [#allocation10 + $0x1], 0  ;;  %s3798_s17 = smov 0   ;;  %s3800_s18 = smov 0  }
   0x9   :  { %s3802_s19 = smov 0   ;;  %s3804_s20 = smov 0  }
   0xa LB: > { %4425 = sst [smem:[#allocation16_spill]] %s3701_s19  ;;  %s3819_s21 = sadd.s32 4294967295, %s3705_s20   ;;  %s3705_s20 = sphi %s3804_s20, %s4444_s20   ;;  %s3701_s19 = sphi %s3802_s19, %s4441_s19   ;;  %s3697_s18 = sphi %s3800_s18, %s4443_s18   ;;  %s3693_s17 = sphi %s3798_s17, %s4442_s17  }
   0xb   : > { %s4419_s22 = sadd.s32 4294967294, %s3705_s20   ;;  %s3823_s23 = sadd.s32 1, %s3705_s20  }
   0xc   : > { %s231_s24 = sadd.s32 1, %s3701_s19  ;;  %s228_s25 = ssub.s32 %s3705_s20, %s3823_s23 }
   0xd   : > { %p241_p0 = scmp.ne.s32.totalorder %s3701_s19, %s3697_s18  ;;  %p229_p1 = scmp.eq.s32.totalorder %s228_s25, 0 }
   0xe   : > { %p242_p2 = scmp.eq.s32.totalorder %s3819_s21, 1  ;;  %p247_p3 = scmp.ne.s32.totalorder %s3697_s18, %s3693_s17 }
   0xf   : > { %p248_p4 = scmp.eq.s32.totalorder %s4419_s22, 1  ;;  %p3118_p7 = scmp.ge.s32.totalorder %s3705_s20, 1 }
  0x10   : > { %s3836_s26 = scalar_select %p229_p1, %s3701_s19, %s231_s24  }
  0x11   : > { %p3838_p5 = por %p242_p2, %p241_p0  ;;  %p3842_p6 = por %p248_p4, %p247_p3 }
  0x12   : > { %4426 = sst [smem:[#allocation17_spill]] %s3836_s26  ;;  %p307_p8 = scmp.lt.s32.totalorder %s3705_s20, 3 }
  0x13   : > { %s4427_s27 = scalar_select %p3838_p5, 1, 0 }
  0x14   : > { %s4428_s28 = scalar_select %p3842_p6, 1, 0 }
  0x15   : > { %p4420_p9 = scmp.eq.s32.totalorder %s3819_s21, 0  ;;  %p3849_p10 = pnand %p3118_p7, %p307_p8 }
  0x16   : > { %s3707_s30 = smov [#allocation5]   ;;  %s3708_s14 = smov [#allocation2]  }
  0x17   : > { %p3374_p11 = pneg %p3849_p10  ;;  %s332_s12 = sshll.u32 %s3707_s30, 4  ;;  %s333_s12 = int_to_ptr.vmem [resolvable:$true] %s332_s12 }
  0x18   : > { %s319_s15 = sshll.u32 %s3708_s14, 4  ;;  %s3709_s16 = smov [#allocation7]   ;;  %s320_s15 = int_to_ptr.vmem [resolvable:$true] %s319_s15 }
  0x19   : > { %p3857_p12 = pnand %p4420_p9, %p3374_p11  ;;  %s360_s24 = sshll.u32 %s3709_s16, 4  ;;  %s361_s24 = int_to_ptr.vmem [resolvable:$true] %s360_s24 }
  0x1a   : > { %s3514_s25 = scalar_lea.vmem %s333_s12, 512  ;;  %p3522_p3 = scmp.lt.s32.totalorder %s333_s12, %s333_s12 }
  0x1b   : > { %p3505_p13 = pneg %p3857_p12  ;;  %p3515_p0 = scmp.ne.s32.totalorder %s333_s12, %s3514_s25 }
  0x1c   : > { %p3523_p4 = scmp.lt.s32.totalorder %s3514_s25, %s3514_s25 }
  0x1d   : > { %p3517_p1 = pnand %p3515_p0, %p3505_p13 }
  0x1e   : > { %p3524_p7 = por %p3523_p4, %p3522_p3 }
  0x1f   : > { %p3518_p2 = pneg %p3517_p1 }
  0x21   : > { %p3525_p8 = pnand %p3524_p7, %p3518_p2 }
  0x23   : > { %3528 = shalt.err (!%p3525_p8)
}
  0x24   : > { %s3710_s30 = smov 128   ;;  %s3711_s14 = smov 8  }
  0x25   : > { %3380 = dma.hbm_to_vmem [thread:$0]  (!%p3857_p12), %s4409_s2, 512, %s333_s12, [#allocation6], %s3710_s30, %s3710_s30, %s3711_s14  }
  0x26   : > { %s3540_s26 = scalar_lea.vmem %s320_s15, 256  ;;  %p3548_p9 = scmp.lt.s32.totalorder %s320_s15, %s320_s15 }
  0x27   : > { %p3541_p11 = scmp.ne.s32.totalorder %s320_s15, %s3540_s26  ;;  %p3549_p6 = scmp.lt.s32.totalorder %s3540_s26, %s3540_s26 }
  0x29   : > { %p3543_p0 = pnand %p3541_p11, %p3505_p13  ;;  %p3550_p3 = por %p3549_p6, %p3548_p9 }
  0x2b   : > { %p3544_p1 = pneg %p3543_p0 }
  0x2d   : > { %p3551_p2 = pnand %p3550_p3, %p3544_p1 }
  0x2f   : > { %3554 = shalt.err (!%p3551_p2)
}
  0x30   : > { %s4431_s1 = sld [smem:[#allocation19_spill]]  ;;  %s3566_s22 = scalar_lea.vmem %s361_s24, 8192 }
  0x31   : > { %p3567_p4 = scmp.ne.s32.totalorder %s361_s24, %s3566_s22  ;;  %p3574_p11 = scmp.lt.s32.totalorder %s361_s24, %s361_s24 }
  0x32   : > { %p3575_p0 = scmp.lt.s32.totalorder %s3566_s22, %s3566_s22 }
  0x33   : > { %p3569_p7 = pnand %p3567_p4, %p3505_p13 }
  0x34   : > { %p3576_p5 = por %p3575_p0, %p3574_p11 }
  0x35   : > { %p3570_p8 = pneg %p3569_p7 }
  0x36   : > { %3377 = dma.hbm_to_vmem [thread:$0]  (!%p3857_p12), %s4431_s1, 256, %s320_s15, [#allocation3], %s3710_s30, %s3710_s30, %s3711_s14  }
  0x37   : > { %p3577_p6 = pnand %p3576_p5, %p3570_p8 }
  0x39   : > { %3580 = shalt.err (!%p3577_p6)
}
  0x3a   : > { %s3712_s26 = smov 4096   ;;  %s3713_s12 = smov 256  }
  0x3b   : > { %3383 = dma.hbm_to_vmem [thread:$0]  (!%p3857_p12), %s4415_s8, 8192, %s361_s24, [#allocation6], %s3712_s26, %s3712_s26, %s3713_s12  }
  0x3c   : > { %383 = sbr.rel (%p3849_p10) target bundleno = 1149 (0x47d), region = 56  ;;  %p4432_p9 = scmp.eq.s32.totalorder (!%p3849_p10), %s3819_s21, 0 }
  0x41   : > { %3676 = dma.done.wait (%p4432_p9), [#allocation3], 256   ;;  %p4433_p13 = pmov %p4432_p9 }
  0x42   : > { %p4434_p5 = pmov %p4432_p9 }
  0x43   : > { %3678 = vsyncadd (%p4433_p13), [#allocation3], 4294967040 }
  0x44   : > { %3680 = dma.done.wait (%p4434_p5), [#allocation6], 8704   ;;  %p4435_p1 = pmov %p4434_p5 }
  0x45   : > { %p440_p3 = scmp.lt.s32.totalorder %s3819_s21, 1  ;;  %v3714_v0 = vmov 0.0   ;;  %vm3715_vm0 = vmmov 0   ;;  %v447_v1 = vld [vmem:[#allocation5 + $0x18] sm:$0xff]  ;;  %v446_v2 = vld [vmem:[#allocation5 + $0x10] sm:$0xff]  ;;  %v445_v3 = vld [vmem:[#allocation5 + $0x8] sm:$0xff]  ;;  %v618_v22 = vlaneseq }
  0x46   : > { %3682 = vsyncadd (%p4435_p1), [#allocation6], 4294958592  ;;  %3254 = vmatprep.subr.mxu0 %v3714_v0  ;;  %3262 = vmatprep.mubr.msk.f32.mxu0 %vm3715_vm0, %v3714_v0  ;;  %s4436_s0 = sld [smem:[#allocation18_spill]]  ;;  %v444_v4 = vld [vmem:[#allocation5] sm:$0xff]  ;;  %vm450_vm1 = vcmask 261120   ;;  %v524_v6 = vld [vmem:[#allocation2] sm:$0xff] }
  0x47   : > { %s441_s29 = scalar_select %p440_p3, %s3819_s21, 1  ;;  %3255 = vmatpush3.msra.mxu0 %v447_v1  ;;  %3265 = vmatprep.subr.mxu1 %v447_v1  ;;  %v742_v7 = vld [vmem:[%s4411_s4 + $0x38] sm:$0xff]  ;;  %v525_v8 = vld [vmem:[#allocation2 + $0x8] sm:$0xff]  ;;  %v741_v9 = vld [vmem:[%s4411_s4 + $0x30] sm:$0xff]  ;;  %v3716_v20 = vmov 1966171168  }
  0x48   : > { %3256 = vmatprep.subr.mxu0 %v3714_v0  ;;  %3266 = vmatpush3.msra.mxu1 %v447_v1  ;;  %v740_v10 = vld [vmem:[%s4411_s4 + $0x28] sm:$0xff]  ;;  %v739_v11 = vld [vmem:[%s4411_s4 + $0x20] sm:$0xff]  ;;  %v738_v12 = vld [vmem:[%s4411_s4 + $0x18] sm:$0xff]  ;;  %v616_v21 = vunpack.c.l.s4 %v3716_v20  ;;  %v3947_v24 = vshrl.u32 %v618_v22, 7  ;;  %vm750_vm2 = vcmask 523264   ;;  %vm1600_vm3 = vcmask 130112  }
  0x49   : > { %s3130_s13 = sshll.u32 %s441_s29, 3  ;;  %3257 = vmatpush3.msra.mxu0 %v446_v2  ;;  %3267 = vmatprep.subr.mxu1 %v446_v2  ;;  %v737_v13 = vld [vmem:[%s4411_s4 + $0x10] sm:$0xff]  ;;  %v736_v14 = vld [vmem:[%s4411_s4 + $0x8] sm:$0xff]  ;;  %v735_v15 = vld [vmem:[%s4411_s4] sm:$0xff]  ;;  %vm1665_vm4 = vcmask 1041409   ;;  %vm1667_vm5 = vcmask 1042434  }
  0x4a   : > { %3258 = vmatprep.subr.mxu0 %v3714_v0  ;;  %3268 = vmatpush3.msra.mxu1 %v446_v2  ;;  %v967_v16 = vld [vmem:[%s4413_s6 + $0x38] sm:$0xff]  ;;  %v966_v17 = vld [vmem:[%s4413_s6 + $0x30] sm:$0xff]  ;;  %v965_v18 = vld [vmem:[%s4413_s6 + $0x28] sm:$0xff]  ;;  %v617_v23 = vunpack.c.0.s8 %v616_v21  ;;  %v665_v28 = vsub.s32 0, %v3947_v24  ;;  %vm1669_vm6 = vcmask 1043459   ;;  %vm1671_vm7 = vcmask 1044484  }
  0x4b   : > { %3259 = vmatpush3.msra.mxu0 %v445_v3  ;;  %3269 = vmatprep.subr.mxu1 %v445_v3  ;;  %v964_v19 = vld [vmem:[%s4413_s6 + $0x20] sm:$0xff]  ;;  %vm1673_vm8 = vcmask 1045509   ;;  %vm1675_vm9 = vcmask 1046534   ;;  %s4141_s22 = sand.u32 1, %s3697_s18   ;;  %vm1677_vm10 = vcmask 1047559   ;;  %vm1562_vm11 = vcmask 130048  }
  0x4c   : > { %s443_s30 = scalar_lea.vmem %s4436_s0, %s3130_s13  ;;  %3260 = vmatprep.subr.mxu0 %v3714_v0  ;;  %3270 = vmatpush3.msra.mxu1 %v445_v3  ;;  %v620_v25 = vsub.s32 %v617_v23, %v3947_v24  ;;  %v3132_v34 = vld [vmem:[%s4410_s3] ss:$0 sm:$0xff]  ;;  %s3128_s26 = sshll.u32 %s4141_s22, 3 }
  0x4d   : > { %v449_v5 = vld [vmem:[%s443_s30] sm:$0xff]  ;;  %3261 = vmatpush3.msra.mxu0 %v444_v4  ;;  %3271 = vmatprep.subr.mxu1 %v444_v4  ;;  %s4193_s12 = scalar_lea.vmem [#allocation9], %s3128_s26  ;;  %s3720_s16 = smov 64  }
  0x4e   : > { %3263 = vmatmul.mubr.msk.f32.vlgmr.msra.gmra.mxu0 %vm450_vm1, %v449_v5  ;;  %3272 = vmatpush3.msra.mxu1 %v444_v4  ;;  %s3721_s19 = smov 72   ;;  %s3722_s29 = smov 80  }
  0x4f   : > { %3273 = vmatprep.mubr.msk.f32.mxu1 %vm450_vm1, %v524_v6  ;;  %3276 = vmatprep.subr.mxu0 %v742_v7  ;;  %s3723_s13 = smov 88   ;;  %s3724_s15 = smov 16  }
  0x50   : > { %3274 = vmatmul.mubr.msk.f32.vlgmr.msra.gmra.mxu1 %vm450_vm1, %v525_v8  ;;  %3277 = vmatpush3.msra.mxu0 %v742_v7  ;;  %s3725_s24 = smov 8   ;;  %s3726_s30 = smov 32  }
  0x51   : > { %3278 = vmatprep.subr.mxu0 %v741_v9  ;;  %3316 = vmatprep.subr.mxu1 %v967_v16  ;;  %s3727_s14 = smov 24   ;;  %s3728_s25 = smov 48  }
  0x52   : > { %3279 = vmatpush3.msra.mxu0 %v741_v9  ;;  %3317 = vmatpush3.msra.mxu1 %v967_v16  ;;  %s3729_s26 = smov 40   ;;  %p4437_p12 = scmp.ne.s32.totalorder %s4427_s27, 0 }
  0x53   : > { %3280 = vmatprep.subr.mxu0 %v740_v10  ;;  %3318 = vmatprep.subr.mxu1 %v966_v17 }
  0x54   : > { %3281 = vmatpush3.msra.mxu0 %v740_v10  ;;  %3319 = vmatpush3.msra.mxu1 %v966_v17 }
  0x55   : > { %3282 = vmatprep.subr.mxu0 %v739_v11  ;;  %3320 = vmatprep.subr.mxu1 %v965_v18 }
  0x56   : > { %3283 = vmatpush3.msra.mxu0 %v739_v11  ;;  %3321 = vmatpush3.msra.mxu1 %v965_v18 }
  0x57   : > { %3284 = vmatprep.subr.mxu0 %v738_v12  ;;  %3322 = vmatprep.subr.mxu1 %v964_v19 }
  0x58   : > { %3285 = vmatpush3.msra.mxu0 %v738_v12  ;;  %3323 = vmatpush3.msra.mxu1 %v964_v19 }
  0x59   : > { %3286 = vmatprep.subr.mxu0 %v737_v13 }
  0x5a   : > { %3287 = vmatpush3.msra.mxu0 %v737_v13 }
  0x5b   : > { %3288 = vmatprep.subr.mxu0 %v736_v14 }
  0x5c   : > { %3289 = vmatpush3.msra.mxu0 %v736_v14 }
  0x5d   : > { %3290 = vmatprep.subr.mxu0 %v735_v15 }
  0x5e   : > { %3291 = vmatpush3.msra.mxu0 %v735_v15 }
 0x10e   : > { %v520_v26 = vpop.f32.mrf.mxu0 }
 0x10f   : > { %v621_v27 = vrot.slane %v520_v26, %v620_v25  ;;  %v614_v31 = vcombine.high %v520_v26, %v520_v26  ;;  %v963_v26 = vld [vmem:[%s4413_s6 + $0x18] sm:$0xff] }
 0x110   : > { %v3275_v29 = vpop.f32.mrf.mxu1  ;;  %v3264_v30 = vpop.f32.mrf.mxu0  ;;  %3324 = vmatprep.subr.mxu1 %v963_v26 }
 0x111   : > { %v629_v32 = vcombine.high %v621_v27, %v621_v27  ;;  %v637_v33 = vrot.slane %v621_v27, %v620_v25  ;;  %v610_v39 = vadd.f32 %v3275_v29, %v3132_v34  ;;  %v628_v41 = vrot.slane %v614_v31, %v620_v25  ;;  %3325 = vmatpush3.msra.mxu1 %v963_v26  ;;  %v962_v27 = vld [vmem:[%s4413_s6 + $0x10] sm:$0xff]  ;;  %v960_v29 = vld [vmem:[%s4413_s6] sm:$0xff] }
 0x112   : > { %v604_v35 = vpop.f32.mrf.mxu1  ;;  %3326 = vmatprep.subr.mxu1 %v962_v27  ;;  %v3135_v30 = vld [vmem:[%s4412_s5] ss:$0 sm:$0xff] }
 0x113   : > { %v651_v36 = vrot.slane %v629_v32, %v620_v25  ;;  %v659_v37 = vcombine.high %v637_v33, %v637_v33  ;;  %v666_v38 = vrot.slane %v637_v33, %v665_v28  ;;  %v605_v40 = vadd.f32 %v3132_v34, %v604_v35  ;;  %3327 = vmatpush3.msra.mxu1 %v962_v27 }
 0x114   : > { %v630_v50 = vcombine.high %v628_v41, %v628_v41  ;;  %v644_v52 = vrot.slane %v628_v41, %v620_v25 }
 0x115   : > { %v670_v42 = vrot.slane %v651_v36, %v665_v28  ;;  %v661_v43 = vcombine.high %v651_v36, %v651_v36  ;;  %v674_v44 = vrot.slane %v659_v37, %v665_v28  ;;  %v703_v45 = vadd.f32 %v666_v38, %v605_v40 }
 0x116   : > { %v704_v46 = vadd.f32 %v666_v38, %v610_v39  ;;  %v658_v58 = vrot.slane %v630_v50, %v620_v25  ;;  %v682_v59 = vrot.slane %v644_v52, %v665_v28  ;;  %v660_v1 = vcombine.high %v644_v52, %v644_v52 }
 0x117   : > { %v719_v47 = vmax.f32 %v703_v45, 0.0  ;;  %v705_v49 = vadd.f32 %v670_v42, %v605_v40  ;;  %v706_v51 = vadd.f32 %v670_v42, %v610_v39  ;;  %v678_v53 = vrot.slane %v661_v43, %v665_v28 }
 0x118   : > { %v720_v48 = vmax.f32 %v704_v46, 0.0  ;;  %v707_v55 = vadd.f32 %v674_v44, %v605_v40  ;;  %v708_v57 = vadd.f32 %v674_v44, %v610_v39  ;;  %v686_v2 = vrot.slane %v658_v58, %v665_v28 }
 0x119   : > { %3292 = vmatprep.mubr.msk.f32.mxu0 %vm750_vm2, %v719_v47  ;;  %v721_v54 = vmax.f32 %v705_v49, 0.0  ;;  %v722_v56 = vmax.f32 %v706_v51, 0.0  ;;  %v709_v61 = vadd.f32 %v678_v53, %v605_v40  ;;  %v710_v63 = vadd.f32 %v678_v53, %v610_v39 }
 0x11a   : > { %3293 = vmatmul.mubr.msk.f32.vlgmr.msra.gmra.mxu0 %vm750_vm2, %v720_v48  ;;  %v723_v60 = vmax.f32 %v707_v55, 0.0  ;;  %v724_v62 = vmax.f32 %v708_v57, 0.0  ;;  %v711_v4 = vadd.f32 %v682_v59, %v605_v40  ;;  %v712_v6 = vadd.f32 %v682_v59, %v610_v39 }
 0x11b   : > { %3295 = vmatprep.mubr.msk.f32.mxu0 %vm750_vm2, %v721_v54  ;;  %v725_v3 = vmax.f32 %v709_v61, 0.0  ;;  %v726_v5 = vmax.f32 %v710_v63, 0.0  ;;  %v662_v7 = vcombine.high %v658_v58, %v658_v58  ;;  %v690_v8 = vrot.slane %v660_v1, %v665_v28 }
 0x11c   : > { %v727_v9 = vmax.f32 %v711_v4, 0.0  ;;  %v713_v10 = vadd.f32 %v686_v2, %v605_v40  ;;  %v728_v11 = vmax.f32 %v712_v6, 0.0  ;;  %v714_v12 = vadd.f32 %v686_v2, %v610_v39 }
 0x11d   : > { %v715_v14 = vadd.f32 %v690_v8, %v605_v40  ;;  %v694_v15 = vrot.slane %v662_v7, %v665_v28  ;;  %v716_v17 = vadd.f32 %v690_v8, %v610_v39  ;;  %v961_v28 = vld [vmem:[%s4413_s6 + $0x8] sm:$0xff] }
 0x11e   : > { %3296 = vmatmul.mubr.msk.f32.gmra.mxu0 %vm750_vm2, %v722_v56  ;;  %v729_v13 = vmax.f32 %v713_v10, 0.0  ;;  %v730_v16 = vmax.f32 %v714_v12, 0.0  ;;  %3328 = vmatprep.subr.mxu1 %v961_v28 }
 0x11f   : > { %3298 = vmatprep.mubr.msk.f32.mxu0 %vm750_vm2, %v723_v60  ;;  %v731_v18 = vmax.f32 %v715_v14, 0.0  ;;  %v717_v19 = vadd.f32 %v694_v15, %v605_v40  ;;  %v732_v20 = vmax.f32 %v716_v17, 0.0  ;;  %v718_v21 = vadd.f32 %v694_v15, %v610_v39  ;;  %3329 = vmatpush3.msra.mxu1 %v961_v28 }
 0x120   : > { %3330 = vmatprep.subr.mxu1 %v960_v29 }
 0x121   : > { %v733_v23 = vmax.f32 %v717_v19, 0.0  ;;  %v734_v25 = vmax.f32 %v718_v21, 0.0  ;;  %3331 = vmatpush3.msra.mxu1 %v960_v29 }
 0x122   : > { %3299 = vmatmul.mubr.msk.f32.gmra.mxu0 %vm750_vm2, %v724_v62 }
 0x123   : > { %3301 = vmatprep.mubr.msk.f32.mxu0 %vm750_vm2, %v725_v3 }
 0x126   : > { %3302 = vmatmul.mubr.msk.f32.gmra.mxu0 %vm750_vm2, %v726_v5 }
 0x127   : > { %3304 = vmatprep.mubr.msk.f32.mxu0 %vm750_vm2, %v727_v9 }
 0x12a   : > { %3305 = vmatmul.mubr.msk.f32.gmra.mxu0 %vm750_vm2, %v728_v11 }
 0x12b   : > { %3307 = vmatprep.mubr.msk.f32.mxu0 %vm750_vm2, %v729_v13 }
 0x12e   : > { %3308 = vmatmul.mubr.msk.f32.gmra.mxu0 %vm750_vm2, %v730_v16  ;;  %v3717_v16 = vmov 8  }
 0x12f   : > { %3310 = vmatprep.mubr.msk.f32.mxu0 %vm750_vm2, %v731_v18  ;;  %3462 = vset.pattern.permute.xlu1 %v3717_v16 }
 0x130   : > { %3461 = vset.pattern.permute.xlu0 %v3717_v16 }
 0x132   : > { %3311 = vmatmul.mubr.msk.f32.gmra.mxu0 %vm750_vm2, %v732_v20  ;;  %v4006_v20 = vld [vmem:[%s4414_s7] ss:$0 sm:$0xff] }
 0x133   : > { %3313 = vmatprep.mubr.msk.f32.mxu0 %vm750_vm2, %v733_v23 }
 0x136   : > { %3314 = vmatmul.mubr.msk.f32.gmra.mxu0 %vm750_vm2, %v734_v25 }
 0x137   : > { %1811 = vmatprep.mubr.f32.mxu0 %v3714_v0 }
 0x1da   : > { %v3294_v31 = vpop.f32.mrf.mxu0 }
 0x1db   : > { %v871_v32 = vadd.f32 %v3294_v31, %v3135_v30 }
 0x1dc   : > { %v865_v33 = vpop.f32.mrf.mxu0 }
 0x1dd   : > { %v866_v34 = vadd.f32 %v3135_v30, %v865_v33  ;;  %v945_v37 = vmax.f32 %v871_v32, 0.0 }
 0x1de   : > { %v3297_v35 = vpop.f32.mrf.mxu0 }
 0x1df   : > { %v944_v36 = vmax.f32 %v866_v34, 0.0  ;;  %v881_v38 = vadd.f32 %v3297_v35, %v3135_v30 }
 0x1e0   : > { %v875_v39 = vpop.f32.mrf.mxu0 }
 0x1e1   : > { %v876_v40 = vadd.f32 %v3135_v30, %v875_v39  ;;  %3332 = vmatprep.mubr.msk.f32.mxu1 %vm750_vm2, %v944_v36  ;;  %v947_v43 = vmax.f32 %v881_v38, 0.0 }
 0x1e2   : > { %v3300_v41 = vpop.f32.mrf.mxu0  ;;  %3333 = vmatmul.mubr.msk.f32.vlgmr.msra.gmra.mxu1 %vm750_vm2, %v945_v37 }
 0x1e3   : > { %v946_v42 = vmax.f32 %v876_v40, 0.0  ;;  %v891_v44 = vadd.f32 %v3300_v41, %v3135_v30 }
 0x1e4   : > { %v885_v45 = vpop.f32.mrf.mxu0 }
 0x1e5   : > { %v886_v46 = vadd.f32 %v3135_v30, %v885_v45  ;;  %3335 = vmatprep.mubr.msk.f32.mxu1 %vm750_vm2, %v946_v42  ;;  %v949_v49 = vmax.f32 %v891_v44, 0.0 }
 0x1e6   : > { %v3303_v47 = vpop.f32.mrf.mxu0  ;;  %3336 = vmatmul.mubr.msk.f32.gmra.mxu1 %vm750_vm2, %v947_v43 }
 0x1e7   : > { %v948_v48 = vmax.f32 %v886_v46, 0.0  ;;  %v901_v50 = vadd.f32 %v3303_v47, %v3135_v30 }
 0x1e8   : > { %v895_v51 = vpop.f32.mrf.mxu0 }
 0x1e9   : > { %v896_v52 = vadd.f32 %v3135_v30, %v895_v51  ;;  %3338 = vmatprep.mubr.msk.f32.mxu1 %vm750_vm2, %v948_v48  ;;  %v951_v55 = vmax.f32 %v901_v50, 0.0 }
 0x1ea   : > { %v3306_v53 = vpop.f32.mrf.mxu0  ;;  %3339 = vmatmul.mubr.msk.f32.gmra.mxu1 %vm750_vm2, %v949_v49 }
 0x1eb   : > { %v950_v54 = vmax.f32 %v896_v52, 0.0  ;;  %v911_v56 = vadd.f32 %v3306_v53, %v3135_v30 }
 0x1ec   : > { %v905_v57 = vpop.f32.mrf.mxu0 }
 0x1ed   : > { %v906_v58 = vadd.f32 %v3135_v30, %v905_v57  ;;  %3341 = vmatprep.mubr.msk.f32.mxu1 %vm750_vm2, %v950_v54  ;;  %v953_v61 = vmax.f32 %v911_v56, 0.0 }
 0x1ee   : > { %v3309_v59 = vpop.f32.mrf.mxu0  ;;  %3342 = vmatmul.mubr.msk.f32.gmra.mxu1 %vm750_vm2, %v951_v55 }
 0x1ef   : > { %v952_v60 = vmax.f32 %v906_v58, 0.0  ;;  %v921_v62 = vadd.f32 %v3309_v59, %v3135_v30 }
 0x1f0   : > { %v915_v63 = vpop.f32.mrf.mxu0 }
 0x1f1   : > { %v916_v1 = vadd.f32 %v3135_v30, %v915_v63  ;;  %3344 = vmatprep.mubr.msk.f32.mxu1 %vm750_vm2, %v952_v60  ;;  %v955_v4 = vmax.f32 %v921_v62, 0.0 }
 0x1f2   : > { %v3312_v2 = vpop.f32.mrf.mxu0  ;;  %3345 = vmatmul.mubr.msk.f32.gmra.mxu1 %vm750_vm2, %v953_v61 }
 0x1f3   : > { %v954_v3 = vmax.f32 %v916_v1, 0.0  ;;  %v931_v5 = vadd.f32 %v3312_v2, %v3135_v30 }
 0x1f4   : > { %v925_v6 = vpop.f32.mrf.mxu0 }
 0x1f5   : > { %v926_v7 = vadd.f32 %v3135_v30, %v925_v6  ;;  %3347 = vmatprep.mubr.msk.f32.mxu1 %vm750_vm2, %v954_v3  ;;  %v957_v10 = vmax.f32 %v931_v5, 0.0 }
 0x1f6   : > { %v3315_v8 = vpop.f32.mrf.mxu0  ;;  %3348 = vmatmul.mubr.msk.f32.gmra.mxu1 %vm750_vm2, %v955_v4 }
 0x1f7   : > { %v956_v9 = vmax.f32 %v926_v7, 0.0  ;;  %v941_v11 = vadd.f32 %v3315_v8, %v3135_v30 }
 0x1f8   : > { %v935_v12 = vpop.f32.mrf.mxu0 }
 0x1f9   : > { %v936_v13 = vadd.f32 %v3135_v30, %v935_v12  ;;  %3350 = vmatprep.mubr.msk.f32.mxu1 %vm750_vm2, %v956_v9  ;;  %v959_v15 = vmax.f32 %v941_v11, 0.0 }
 0x1fa   : > { %3351 = vmatmul.mubr.msk.f32.gmra.mxu1 %vm750_vm2, %v957_v10 }
 0x1fb   : > { %v958_v14 = vmax.f32 %v936_v13, 0.0 }
 0x1fd   : > { %3353 = vmatprep.mubr.msk.f32.mxu1 %vm750_vm2, %v958_v14 }
 0x1fe   : > { %3354 = vmatmul.mubr.msk.f32.gmra.mxu1 %vm750_vm2, %v959_v15 }
 0x1ff   : > { %1882 = vmatprep.mubr.f32.mxu1 %v3714_v0 }
 0x2a2   : > { %v3334_v17 = vpop.f32.mrf.mxu1 }
 0x2a3   : > { %v4012_v26 = vadd.f32 %v3334_v17, %v4006_v20 }
 0x2a4   : > { %v1089_v18 = vpop.f32.mrf.mxu1 }
 0x2a5   : > { %v4023_v31 = vadd.f32 %v4006_v20, %v1089_v18 }
 0x2a6   : > { %v3337_v19 = vpop.f32.mrf.mxu1 }
 0x2a7   : > { %v4009_v23 = vadd.f32 %v3337_v19, %v4006_v20 }
 0x2a8   : > { %v1099_v21 = vpop.f32.mrf.mxu1 }
 0x2a9   : > { %v4018_v28 = vadd.f32 %v4006_v20, %v1099_v21  ;;  %v1169_v30 = vmax.f32 %v4012_v26, %v4009_v23 }
 0x2aa   : > { %v3340_v25 = vpop.f32.mrf.mxu1 }
 0x2ab   : > { %v4015_v27 = vadd.f32 %v3340_v25, %v4006_v20  ;;  %v1168_v36 = vmax.f32 %v4023_v31, %v4018_v28 }
 0x2ac   : > { %v1109_v29 = vpop.f32.mrf.mxu1 }
 0x2ad   : > { %v4026_v32 = vadd.f32 %v4006_v20, %v1109_v29  ;;  %v1173_v34 = vmax.f32 %v1169_v30, %v4015_v27 }
 0x2ae   : > { %v3343_v33 = vpop.f32.mrf.mxu1 }
 0x2af   : > { %v4030_v35 = vadd.f32 %v3343_v33, %v4006_v20  ;;  %v1172_v40 = vmax.f32 %v1168_v36, %v4026_v32 }
 0x2b0   : > { %v1119_v37 = vpop.f32.mrf.mxu1 }
 0x2b1   : > { %v1177_v38 = vmax.f32 %v1173_v34, %v4030_v35  ;;  %v4036_v39 = vadd.f32 %v4006_v20, %v1119_v37 }
 0x2b2   : > { %v3346_v41 = vpop.f32.mrf.mxu1 }
 0x2b3   : > { %v1181_v42 = vsub.f32 %v4012_v26, %v1177_v38  ;;  %v1183_v43 = vsub.f32 %v4009_v23, %v1177_v38  ;;  %v1185_v44 = vsub.f32 %v4015_v27, %v1177_v38  ;;  %v1187_v45 = vsub.f32 %v4030_v35, %v1177_v38 }
 0x2b4   : > { %v1176_v46 = vmax.f32 %v1172_v40, %v4036_v39  ;;  %v1129_v47 = vpop.f32.mrf.mxu1  ;;  %v4052_v63 = vadd.f32 %v3346_v41, %v4006_v20 }
 0x2b5   : > { %v1198_v48 = vmul.f32 1.442695, %v1181_v42  ;;  %v1202_v49 = vmul.f32 1.442695, %v1183_v43  ;;  %v1206_v50 = vmul.f32 1.442695, %v1185_v44  ;;  %v4063_v6 = vadd.f32 %v4006_v20, %v1129_v47 }
 0x2b6   : > { %v1210_v51 = vmul.f32 1.442695, %v1187_v45  ;;  %v1180_v52 = vsub.f32 %v4023_v31, %v1176_v46  ;;  %v1182_v53 = vsub.f32 %v4018_v28, %v1176_v46  ;;  %v1184_v54 = vsub.f32 %v4026_v32, %v1176_v46  ;;  %v3349_v55 = vpop.f32.mrf.mxu1 }
 0x2b7   : > { %3463 = vpow2.f32 %v1198_v48  ;;  %v1186_v56 = vsub.f32 %v4036_v39, %v1176_v46  ;;  %v4049_v60 = vadd.f32 %v3349_v55, %v4006_v20 }
 0x2b8   : > { %3465 = vpow2.f32 %v1202_v49  ;;  %v1196_v57 = vmul.f32 1.442695, %v1180_v52  ;;  %v1200_v58 = vmul.f32 1.442695, %v1182_v53  ;;  %v1139_v59 = vpop.f32.mrf.mxu1  ;;  %v1204_v61 = vmul.f32 1.442695, %v1184_v54 }
 0x2b9   : > { %3467 = vpow2.f32 %v1206_v50  ;;  %v1208_v2 = vmul.f32 1.442695, %v1186_v56  ;;  %v4058_v3 = vadd.f32 %v4006_v20, %v1139_v59  ;;  %v1171_v5 = vmax.f32 %v4052_v63, %v4049_v60 }
 0x2ba   : > { %3469 = vpow2.f32 %v1210_v51  ;;  %v3352_v62 = vpop.f32.mrf.mxu1 }
 0x2bb   : > { %3471 = vpow2.f32 %v1196_v57  ;;  %v4055_v1 = vadd.f32 %v3352_v62, %v4006_v20  ;;  %v1170_v11 = vmax.f32 %v4063_v6, %v4058_v3 }
 0x2bc   : > { %3473 = vpow2.f32 %v1200_v58  ;;  %v1149_v4 = vpop.f32.mrf.mxu1 }
 0x2bd   : > { %3475 = vpow2.f32 %v1204_v61  ;;  %v4066_v7 = vadd.f32 %v4006_v20, %v1149_v4  ;;  %v1175_v9 = vmax.f32 %v1171_v5, %v4055_v1 }
 0x2be   : > { %v3355_v8 = vpop.f32.mrf.mxu1  ;;  %3477 = vpow2.f32 %v1208_v2 }
 0x2bf   : > { %v4070_v10 = vadd.f32 %v3355_v8, %v4006_v20  ;;  %v1174_v15 = vmax.f32 %v1170_v11, %v4066_v7 }
 0x2c0   : > { %v1159_v12 = vpop.f32.mrf.mxu1 }
 0x2c1   : > { %v1179_v13 = vmax.f32 %v1175_v9, %v4070_v10  ;;  %v4076_v14 = vadd.f32 %v4006_v20, %v1159_v12 }
 0x2c3   : > { %v1189_v16 = vsub.f32 %v4052_v63, %v1179_v13  ;;  %v1191_v17 = vsub.f32 %v4049_v60, %v1179_v13  ;;  %v1193_v18 = vsub.f32 %v4055_v1, %v1179_v13  ;;  %v1195_v19 = vsub.f32 %v4070_v10, %v1179_v13  ;;  %v1714_v13 = vld [vmem:[#allocation7 + $0x108] sm:$0xff] }
 0x2c4   : > { %v3464_v21 = vpop.eup %3463  ;;  %v1178_v25 = vmax.f32 %v1174_v15, %v4076_v14  ;;  %v1716_v15 = vld [vmem:[#allocation7 + $0x118] sm:$0xff]  ;;  %1775 = vmatprep.subr.mxu0 %v1714_v13 }
 0x2c5   : > { %v3466_v29 = vpop.eup %3465  ;;  %v1214_v30 = vmul.f32 1.442695, %v1189_v16  ;;  %v1218_v33 = vmul.f32 1.442695, %v1191_v17  ;;  %v1222_v34 = vmul.f32 1.442695, %v1193_v18  ;;  %1846 = vmatprep.subr.mxu1 %v1716_v15 }
 0x2c6   : > { %v3468_v36 = vpop.eup %3467  ;;  %v1229_v20 = vadd.f32 %v3466_v29, %v3464_v21  ;;  %v1226_v37 = vmul.f32 1.442695, %v1195_v19  ;;  %v1188_v38 = vsub.f32 %v4063_v6, %v1178_v25  ;;  %v1190_v40 = vsub.f32 %v4058_v3, %v1178_v25  ;;  %v1713_v16 = vld [vmem:[#allocation7 + $0x100] sm:$0xff]  ;;  %v1715_v18 = vld [vmem:[#allocation7 + $0x110] sm:$0xff] }
 0x2c7   : > { %v3470_v41 = vpop.eup %3469  ;;  %3479 = vpow2.f32 %v1214_v30  ;;  %v1192_v42 = vsub.f32 %v4066_v7, %v1178_v25  ;;  %v1194_v47 = vsub.f32 %v4076_v14, %v1178_v25  ;;  %1776 = vmatpush1.msra.mxu0 %v1713_v16  ;;  %1847 = vmatpush1.msra.mxu1 %v1715_v18 }
 0x2c8   : > { %v3472_v43 = vpop.eup %3471  ;;  %v1233_v44 = vadd.f32 %v3468_v36, %v1229_v20  ;;  %3481 = vpow2.f32 %v1218_v33  ;;  %v1212_v45 = vmul.f32 1.442695, %v1188_v38  ;;  %v1216_v48 = vmul.f32 1.442695, %v1190_v40 }
 0x2c9   : > { %v3474_v46 = vpop.eup %3473  ;;  %3483 = vpow2.f32 %v1222_v34  ;;  %v1220_v52 = vmul.f32 1.442695, %v1192_v42  ;;  %v1224_v55 = vmul.f32 1.442695, %v1194_v47 }
 0x2ca   : > { %v1237_v49 = vadd.f32 %v3470_v41, %v1233_v44  ;;  %v1228_v50 = vadd.f32 %v3474_v46, %v3472_v43  ;;  %3485 = vpow2.f32 %v1226_v37  ;;  %v3476_v51 = vpop.eup %3475 }
 0x2cb   : > { %3487 = vpow2.f32 %v1212_v45  ;;  %v3478_v54 = vpop.eup %3477 }
 0x2cc   : > { %3489 = vrcp.f32 %v1237_v49  ;;  %v1232_v53 = vadd.f32 %v3476_v51, %v1228_v50  ;;  %v1681_v49 = vld [vmem:[#allocation7] sm:$0xff] }
 0x2cd   : > { %3491 = vpow2.f32 %v1216_v48  ;;  %v1682_v48 = vld [vmem:[#allocation7 + $0x8] sm:$0xff] }
 0x2ce   : > { %v1236_v56 = vadd.f32 %v3478_v54, %v1232_v53  ;;  %3493 = vpow2.f32 %v1220_v52  ;;  %1777 = vmatprep.subr.mxu0 %v1682_v48 }
 0x2cf   : > { %1778 = vmatpush1.msra.mxu0 %v1681_v49 }
 0x2d0   : > { %3495 = vrcp.f32 %v1236_v56 }
 0x2d1   : > { %3497 = vpow2.f32 %v1224_v55  ;;  %v1720_v55 = vld [vmem:[#allocation7 + $0x138] sm:$0xff] }
 0x2d4   : > { %v3480_v57 = vpop.eup %3479 }
 0x2d5   : > { %v3482_v58 = vpop.eup %3481 }
 0x2d6   : > { %v3484_v59 = vpop.eup %3483  ;;  %v1231_v61 = vadd.f32 %v3482_v58, %v3480_v57 }
 0x2d7   : > { %v3486_v62 = vpop.eup %3485 }
 0x2d8   : > { %v3488_v2 = vpop.eup %3487  ;;  %v1235_v4 = vadd.f32 %v3484_v59, %v1231_v61 }
 0x2d9   : > { %v3490_v5 = vpop.eup %3489 }
 0x2da   : > { %v3492_v8 = vpop.eup %3491  ;;  %v1239_v9 = vadd.f32 %v3486_v62, %v1235_v4  ;;  %v1245_v11 = vmul.f32 %v3490_v5, %v3466_v29  ;;  %v1243_v12 = vmul.f32 %v3490_v5, %v3464_v21  ;;  %v1247_v34 = vmul.f32 %v3490_v5, %v3468_v36  ;;  %v1684_v36 = vld [vmem:[#allocation7 + $0x18] sm:$0xff] }
 0x2db   : > { %v1230_v17 = vadd.f32 %v3492_v8, %v3488_v2  ;;  %v3494_v19 = vpop.eup %3493  ;;  %v1249_v21 = vmul.f32 %v3490_v5, %v3470_v41  ;;  %1848 = vmatprep.subr.mxu1 %v1684_v36  ;;  %v1683_v41 = vld [vmem:[#allocation7 + $0x10] sm:$0xff]  ;;  %v3718_v5 = vmov 1983009808  }
 0x2dc   : > { %3499 = vrcp.f32 %v1239_v9  ;;  %1291 = vperm.xlu1 %3462, %v1245_v11   ;;  %1267 = vperm.xlu0 %3461, %v1243_v12  }
 0x2dd   : > { %v3496_v25 = vpop.eup %3495  ;;  %v1234_v30 = vadd.f32 %v3494_v19, %v1230_v17  ;;  %1849 = vmatpush1.msra.mxu1 %v1683_v41 }
 0x2de   : > { %v3498_v33 = vpop.eup %3497  ;;  %v1241_v20 = vmul.f32 %v3496_v25, %v3472_v43  ;;  %v1246_v37 = vmul.f32 %v3496_v25, %v3476_v51  ;;  %v1244_v38 = vmul.f32 %v3496_v25, %v3474_v46  ;;  %v1248_v40 = vmul.f32 %v3496_v25, %v3478_v54  ;;  %v1718_v54 = vld [vmem:[#allocation7 + $0x128] sm:$0xff]  ;;  %1988 = vmatprep.subr.mxu1 %v1720_v55 }
 0x2df   : > { %v1238_v29 = vadd.f32 %v3498_v33, %v1234_v30  ;;  %1917 = vmatprep.subr.mxu0 %v1718_v54 }
 0x2e0   : > { %1319 = vperm.xlu1 %3462, %v1247_v34   ;;  %1262 = vperm.xlu0 %3461, %v1241_v20  }
 0x2e1   : > { %3501 = vrcp.f32 %v1238_v29 }
 0x2e4   : > { %1347 = vperm.xlu1 %3462, %v1249_v21   ;;  %1314 = vperm.xlu0 %3461, %v1246_v37  }
 0x2e8   : > { %1286 = vperm.xlu1 %3462, %v1244_v38   ;;  %1342 = vperm.xlu0 %3461, %v1248_v40  }
 0x2e9   : > { %v3500_v42 = vpop.eup %3499 }
 0x2ea   : > { %v1253_v44 = vmul.f32 %v3500_v42, %v3480_v57  ;;  %v1255_v47 = vmul.f32 %v3500_v42, %v3482_v58  ;;  %v1257_v50 = vmul.f32 %v3500_v42, %v3484_v59  ;;  %v1259_v51 = vmul.f32 %v3500_v42, %v3486_v62 }
 0x2ec   : > { %1277 = vperm.xlu1 %3462, %v1253_v44  }
 0x2ee   : > { %v3502_v45 = vpop.eup %3501 }
 0x2ef   : > { %v1251_v43 = vmul.f32 %v3502_v45, %v3488_v2  ;;  %v1254_v46 = vmul.f32 %v3502_v45, %v3492_v8  ;;  %v1256_v52 = vmul.f32 %v3502_v45, %v3494_v19  ;;  %v1258_v53 = vmul.f32 %v3502_v45, %v3498_v33 }
 0x2f0   : > { %1301 = vperm.xlu1 %3462, %v1255_v47   ;;  %v1590_v2 = vand.u32 127, %v618_v22  ;;  %v1370_v8 = vunpack.c.l.s4 %v3718_v5 }
 0x2f1   : > { %1272 = vperm.xlu0 %3461, %v1251_v43  }
 0x2f2   : > { %v1595_v9 = vadd.s32 4294967288, %v1590_v2  ;;  %v1371_v12 = vunpack.c.0.s8 %v1370_v8  ;;  %v4103_v16 = vsub.s32 %v1590_v2, %v3947_v24 }
 0x2f4   : > { %1329 = vperm.xlu1 %3462, %v1257_v50   ;;  %v4100_v15 = vsub.s32 %v1595_v9, %v3947_v24  ;;  %v4110_v25 = vsub.s32 %v1371_v12, %v3947_v24 }
 0x2f5   : > { %1296 = vperm.xlu0 %3461, %v1254_v46  }
 0x2f8   : > { %1357 = vperm.xlu1 %3462, %v1259_v51  }
 0x2f9   : > { %1324 = vperm.xlu0 %3461, %v1256_v52  }
 0x2fd   : > { %1352 = vperm.xlu0 %3461, %v1258_v53  }
 0x357   : > { %v1292_v56 = vpop.permute.xlu1 %1291  ;;  %v1268_v57 = vpop.permute.xlu0 %1267 }
 0x358   : > { %v1305_v17 = vmul.f32 %v1292_v56, %v4009_v23  ;;  %v1281_v22 = vmul.f32 %v1268_v57, %v4012_v26  ;;  %v1609_v33 = vrot.slane %v1292_v56, %v4100_v15  ;;  %v3719_v26 = vmov 1934713408  }
 0x359   : > { %v1401_v29 = vunpack.c.l.s4 %v3719_v26  ;;  %v1599_v37 = vrot.slane %v1268_v57, %v4100_v15 }
 0x35a   : > { %v1309_v21 = vadd.f32 %v1305_v17, %v1281_v22 }
 0x35b   : > { %v1320_v58 = vpop.permute.xlu1 %1319  ;;  %v4088_v61 = vpop.permute.xlu0 %1262  ;;  %v1402_v46 = vunpack.c.0.s8 %v1401_v29 }
 0x35c   : > { %v1333_v34 = vmul.f32 %v1320_v58, %v4015_v27  ;;  %v1594_v20 = vrot.slane %v4088_v61, %v4103_v16 }
 0x35e   : > { %v1337_v47 = vadd.f32 %v1333_v34, %v1309_v21  ;;  %v1601_v48 = vsel %vm1600_vm3, %v1599_v37, %v1594_v20 }
 0x35f   : > { %v4090_v59 = vpop.permute.xlu1 %1347  ;;  %v4093_v4 = vpop.permute.xlu0 %1314 }
 0x360   : > { %v1361_v38 = vmul.f32 %v4090_v59, %v4030_v35  ;;  %v1614_v27 = vrot.slane %v4093_v4, %v4103_v16  ;;  %v1618_v35 = vrot.slane %v1320_v58, %v4100_v15  ;;  %v1627_v56 = vrot.slane %v4090_v59, %v4100_v15 }
 0x362   : > { %v4132_v41 = vadd.f32 %v1361_v38, %v1337_v47  ;;  %v1619_v51 = vsel %vm1600_vm3, %v1618_v35, %v1614_v27  ;;  %v1719_v38 = vld [vmem:[#allocation7 + $0x130] sm:$0xff]  ;;  %v1685_v27 = vld [vmem:[#allocation7 + $0x20] sm:$0xff] }
 0x363   : > { %v4095_v62 = vpop.permute.xlu1 %1286  ;;  %v4097_v13 = vpop.permute.xlu0 %1342  ;;  %v1721_v47 = vld [vmem:[#allocation7 + $0x140] sm:$0xff]  ;;  %v1723_v35 = vld [vmem:[#allocation7 + $0x150] sm:$0xff] }
 0x364   : > { %v1605_v18 = vrot.slane %v4095_v62, %v4103_v16  ;;  %v1304_v12 = vmul.f32 %v4095_v62, %v4018_v28  ;;  %v1280_v28 = vmul.f32 %v4088_v61, %v4023_v31  ;;  %v1688_v61 = vld [vmem:[#allocation7 + $0x38] sm:$0xff] }
 0x366   : > { %v1610_v40 = vsel %vm1600_vm3, %v1609_v33, %v1605_v18 }
 0x367   : > { %v1278_v11 = vpop.permute.xlu1 %1277  ;;  %v1666_v36 = vsel %vm1665_vm4, %v1610_v40, %v1601_v48 }
 0x368   : > { %v1283_v44 = vmul.f32 %v1278_v11, %v4052_v63  ;;  %v1623_v63 = vrot.slane %v4097_v13, %v4103_v16  ;;  %v1636_v52 = vrot.slane %v1278_v11, %v4100_v15  ;;  %v1668_v57 = vsel %vm1667_vm5, %v1619_v51, %v1666_v36  ;;  %v1690_v36 = vld [vmem:[#allocation7 + $0x48] sm:$0xff]  ;;  %v1728_v51 = vld [vmem:[#allocation7 + $0x178] sm:$0xff] }
 0x36a   : > { %v1628_v11 = vsel %vm1600_vm3, %v1627_v56, %v1623_v63  ;;  %v1694_v56 = vld [vmem:[#allocation7 + $0x68] sm:$0xff] }
 0x36b   : > { %v1302_v19 = vpop.permute.xlu1 %1301  ;;  %v1670_v17 = vsel %vm1669_vm6, %v1628_v11, %v1668_v57 }
 0x36c   : > { %v4112_v30 = vpop.permute.xlu0 %1272  ;;  %v1307_v23 = vmul.f32 %v1302_v19, %v4049_v60  ;;  %v1645_v58 = vrot.slane %v1302_v19, %v4100_v15 }
 0x36d   : > { %v1632_v43 = vrot.slane %v4112_v30, %v4103_v16 }
 0x36e   : > { %v1311_v49 = vadd.f32 %v1307_v23, %v1283_v44  ;;  %v4171_v23 = vsub.s32 %v1402_v46, %v3947_v24  ;;  %v1282_v24 = vmul.f32 %v4112_v30, %v4063_v6  ;;  %v1687_v44 = vld [vmem:[#allocation7 + $0x30] sm:$0xff]  ;;  %v1724_v30 = vld [vmem:[#allocation7 + $0x158] sm:$0xff]  ;;  %v1726_v46 = vld [vmem:[#allocation7 + $0x168] sm:$0xff] }
 0x36f   : > { %v1330_v42 = vpop.permute.xlu1 %1329  ;;  %v1637_v5 = vsel %vm1600_vm3, %v1636_v52, %v1632_v43 }
 0x370   : > { %v1297_v45 = vpop.permute.xlu0 %1296  ;;  %v1335_v60 = vmul.f32 %v1330_v42, %v4055_v1  ;;  %v1654_v8 = vrot.slane %v1330_v42, %v4100_v15  ;;  %v1672_v33 = vsel %vm1671_vm7, %v1637_v5, %v1670_v17  ;;  %v1332_v42 = vmul.f32 %v4093_v4, %v4026_v32  ;;  %v1722_v4 = vld [vmem:[#allocation7 + $0x148] sm:$0xff]  ;;  %v1732_v17 = vld [vmem:[#allocation7 + $0x198] sm:$0xff] }
 0x371   : > { %v1641_v1 = vrot.slane %v1297_v45, %v4103_v16  ;;  %v1306_v62 = vmul.f32 %v1297_v45, %v4058_v3  ;;  %v1686_v3 = vld [vmem:[#allocation7 + $0x28] sm:$0xff] }
 0x372   : > { %v1339_v53 = vadd.f32 %v1335_v60, %v1311_v49  ;;  %v1692_v49 = vld [vmem:[#allocation7 + $0x58] sm:$0xff] }
 0x373   : > { %v1358_v50 = vpop.permute.xlu1 %1357  ;;  %v1646_v59 = vsel %vm1600_vm3, %v1645_v58, %v1641_v1  ;;  %v1310_v6 = vadd.f32 %v1306_v62, %v1282_v24  ;;  %v1700_v62 = vld [vmem:[#allocation7 + $0x98] sm:$0xff]  ;;  %v1733_v24 = vld [vmem:[#allocation7 + $0x1a0] sm:$0xff] }
 0x374   : > { %v1325_v54 = vpop.permute.xlu0 %1324  ;;  %v1363_v55 = vmul.f32 %v1358_v50, %v4070_v10  ;;  %v4154_v10 = vrot.slane %v4132_v41, %v4110_v25  ;;  %v1663_v34 = vrot.slane %v1358_v50, %v4100_v15  ;;  %v1674_v26 = vsel %vm1673_vm8, %v1646_v59, %v1672_v33  ;;  %v1717_v15 = vld [vmem:[#allocation7 + $0x120] sm:$0xff] }
 0x375   : > { %v1650_v2 = vrot.slane %v1325_v54, %v4103_v16  ;;  %v1334_v40 = vmul.f32 %v1325_v54, %v4066_v7  ;;  %v1725_v54 = vld [vmem:[#allocation7 + $0x160] sm:$0xff] }
 0x376   : > { %v4150_v9 = vadd.f32 %v1363_v55, %v1339_v53  ;;  %v1727_v55 = vld [vmem:[#allocation7 + $0x170] sm:$0xff]  ;;  %v1729_v33 = vld [vmem:[#allocation7 + $0x180] sm:$0xff] }
 0x377   : > { %v1655_v22 = vsel %vm1600_vm3, %v1654_v8, %v1650_v2  ;;  %v1338_v60 = vadd.f32 %v1334_v40, %v1310_v6  ;;  %v1696_v2 = vld [vmem:[#allocation7 + $0x78] sm:$0xff]  ;;  %v1693_v8 = vld [vmem:[#allocation7 + $0x60] sm:$0xff]  ;;  %v1735_v40 = vld [vmem:[#allocation7 + $0x1b0] sm:$0xff] }
 0x378   : > { %v4165_v18 = vrot.slane %v4150_v9, %v4110_v25  ;;  %v1353_v19 = vpop.permute.xlu0 %1352  ;;  %v1676_v21 = vsel %vm1675_vm9, %v1655_v22, %v1674_v26  ;;  %v1703_v6 = vld [vmem:[#allocation7 + $0xb0] sm:$0xff] }
 0x379   : > { %v1659_v20 = vrot.slane %v1353_v19, %v4103_v16  ;;  %v1308_v16 = vadd.f32 %v1304_v12, %v1280_v28  ;;  %v1362_v7 = vmul.f32 %v1353_v19, %v4076_v14  ;;  %v1360_v14 = vmul.f32 %v4097_v13, %v4036_v39  ;;  %v1689_v39 = vld [vmem:[#allocation7 + $0x40] sm:$0xff]  ;;  %v1691_v13 = vld [vmem:[#allocation7 + $0x50] sm:$0xff]  ;;  %v1730_v12 = vld [vmem:[#allocation7 + $0x188] sm:$0xff] }
 0x37a   : > { %v1464_v29 = vcombine.low %v4154_v10, %v4165_v18  ;;  %v1465_v63 = vcombine.high %v4154_v10, %v4165_v18  ;;  %v1695_v10 = vld [vmem:[#allocation7 + $0x70] sm:$0xff]  ;;  %v1698_v28 = vld [vmem:[#allocation7 + $0x88] sm:$0xff] }
 0x37b   : > { %v1664_v37 = vsel %vm1600_vm3, %v1663_v34, %v1659_v20  ;;  %v1336_v45 = vadd.f32 %v1332_v42, %v1308_v16  ;;  %v1366_v48 = vadd.f32 %v1362_v7, %v1338_v60  ;;  %v1731_v20 = vld [vmem:[#allocation7 + $0x190] sm:$0xff]  ;;  %v1704_v42 = vld [vmem:[#allocation7 + $0xb8] sm:$0xff]  ;;  %v1737_v60 = vld [vmem:[#allocation7 + $0x1c0] sm:$0xff] }
 0x37c   : > { %v4185_v31 = vsel %vm1677_vm10, %v1664_v37, %v1676_v21  ;;  %v1472_v32 = vrot.slane %v1464_v29, %v4171_v23  ;;  %v1479_v52 = vrot.slane %v1465_v63, %v4171_v23  ;;  %v1697_v29 = vld [vmem:[#allocation7 + $0x80] sm:$0xff]  ;;  %v1699_v21 = vld [vmem:[#allocation7 + $0x90] sm:$0xff]  ;;  %v1744_v63 = vld [vmem:[#allocation7 + $0x1f8] sm:$0xff] }
 0x37d   : > { %3169 = vmatmul.mubr.msk.f32.vlgmr.msra.gmra.mxu0 %vm1562_vm11, %v4185_v31  ;;  %3170 = vmatmul.mubr.msk.f32.vlgmr.msra.gmra.mxu1 %vm1562_vm11, %v4185_v31  ;;  %1680 = vst.msk [vmem:[%s4193_s12] sm:$0xff] %vm1562_vm11, %v4185_v31  ;;  %v1364_v1 = vadd.f32 %v1360_v14, %v1336_v45  ;;  %v1390_v50 = vrot.slane %v1366_v48, %v4110_v25  ;;  %v1706_v14 = vld [vmem:[#allocation7 + $0xc8] sm:$0xff] }
 0x37e   : > { %1918 = vmatpush1.msra.mxu0 %v1717_v15  ;;  %1989 = vmatpush1.msra.mxu1 %v1719_v38  ;;  %v1496_v43 = vcombine.high %v1472_v32, %v3714_v0  ;;  %v1383_v57 = vcombine.high %v1366_v48, %v3714_v0  ;;  %v1497_v5 = vcombine.high %v1479_v52, %v3714_v0  ;;  %v1734_v15 = vld [vmem:[#allocation7 + $0x1a8] sm:$0xff]  ;;  %v1736_v38 = vld [vmem:[#allocation7 + $0x1b8] sm:$0xff] }
 0x37f   : > { %1919 = vmatprep.subr.mxu0 %v1686_v3  ;;  %1990 = vmatprep.subr.mxu1 %v1688_v61  ;;  %v1375_v53 = vrot.slane %v1364_v1, %v4110_v25  ;;  %v1368_v59 = vcombine.high %v1364_v1, %v3714_v0  ;;  %v1702_v3 = vld [vmem:[#allocation7 + $0xa8] sm:$0xff]  ;;  %v1449_v61 = vcombine.high %v4150_v9, %v3714_v0  ;;  %v1708_v48 = vld [vmem:[#allocation7 + $0xd8] sm:$0xff] }
 0x380   : > { %1920 = vmatpush1.msra.mxu0 %v1685_v27  ;;  %1991 = vmatpush1.msra.mxu1 %v1687_v44  ;;  %v4224_v22 = vrot.slane %v1383_v57, %v4110_v25  ;;  %v1701_v44 = vld [vmem:[#allocation7 + $0xa0] sm:$0xff]  ;;  %v1738_v9 = vld [vmem:[#allocation7 + $0x1c8] sm:$0xff] }
 0x381   : > { %1953 = vmatprep.mubr.f32.mxu0 %v3714_v0  ;;  %2024 = vmatprep.mubr.f32.mxu1 %v3714_v0  ;;  %v1398_v58 = vcombine.low %v1375_v53, %v1390_v50  ;;  %v1399_v11 = vcombine.high %v1375_v53, %v1390_v50  ;;  %v1382_v34 = vrot.slane %v1368_v59, %v4110_v25  ;;  %v1710_v50 = vld [vmem:[#allocation7 + $0xe8] sm:$0xff]  ;;  %v1709_v53 = vld [vmem:[#allocation7 + $0xe0] sm:$0xff] }
 0x382   : > { %2059 = vmatprep.subr.mxu0 %v1722_v4  ;;  %2130 = vmatprep.subr.mxu1 %v1724_v30  ;;  %v1740_v4 = vld [vmem:[#allocation7 + $0x1d8] sm:$0xff]  ;;  %v1463_v30 = vrot.slane %v1449_v61, %v4110_v25 }
 0x383   : > { %1529 = vrot.lane.b32.xlu1 %v1472_v32, %s3720_s16  ;;  %3171 = vmatmul.mubr.msk.f32.vlgmr.msra.gmra.mxu0 %vm1562_vm11, %v4185_v31  ;;  %v4227_v18 = vrot.slane %v1398_v58, %v4171_v23  ;;  %v1413_v19 = vrot.slane %v1399_v11, %v4171_v23  ;;  %v1414_v37 = vcombine.low %v1382_v34, %v4224_v22  ;;  %s3730_s16 = smov 96  }
 0x384   : > { %3172 = vmatmul.mubr.msk.f32.vlgmr.msra.gmra.mxu1 %vm1562_vm11, %v4185_v31  ;;  %2060 = vmatpush1.msra.mxu0 %v1721_v47  ;;  %v1415_v7 = vcombine.high %v1382_v34, %v4224_v22  ;;  %v1434_v32 = vcombine.high %v4132_v41, %v3714_v0  ;;  %v1739_v47 = vld [vmem:[#allocation7 + $0x1d0] sm:$0xff] }
 0x385   : > { %2131 = vmatpush1.msra.mxu1 %v1723_v35  ;;  %2061 = vmatprep.subr.mxu0 %v1690_v36  ;;  %v1430_v26 = vcombine.high %v4227_v18, %v3714_v0  ;;  %v1422_v16 = vrot.slane %v1414_v37, %v4171_v23  ;;  %v1431_v27 = vcombine.high %v1413_v19, %v3714_v0  ;;  %v1705_v36 = vld [vmem:[#allocation7 + $0xc0] sm:$0xff] }
 0x386   : > { %2132 = vmatprep.subr.mxu1 %v1692_v49  ;;  %1533 = vrot.lane.b32.xlu0 %v1496_v43, %s3721_s19  ;;  %v1429_v45 = vrot.slane %v1415_v7, %v4171_v23  ;;  %v1448_v41 = vrot.slane %v1434_v32, %v4110_v25  ;;  %v1707_v43 = vld [vmem:[#allocation7 + $0xd0] sm:$0xff]  ;;  %v1742_v25 = vld [vmem:[#allocation7 + $0x1e8] sm:$0xff]  ;;  %s3731_s19 = smov 56  }
 0x387   : > { %2062 = vmatpush1.msra.mxu0 %v1689_v39  ;;  %2133 = vmatpush1.msra.mxu1 %v1691_v13  ;;  %v1432_v35 = vcombine.high %v1422_v16, %v3714_v0  ;;  %v1741_v39 = vld [vmem:[#allocation7 + $0x1e0] sm:$0xff]  ;;  %v1743_v13 = vld [vmem:[#allocation7 + $0x1f0] sm:$0xff] }
 0x388   : > { %2095 = vmatprep.mubr.f32.mxu0 %v3714_v0  ;;  %2166 = vmatprep.mubr.f32.mxu1 %v3714_v0  ;;  %v1480_v49 = vcombine.low %v1448_v41, %v1463_v30 }
 0x389   : > { %2201 = vmatprep.subr.mxu0 %v1726_v46  ;;  %2272 = vmatprep.subr.mxu1 %v1728_v51  ;;  %v1712_v46 = vld [vmem:[#allocation7 + $0xf8] sm:$0xff]  ;;  %v1481_v51 = vcombine.high %v1448_v41, %v1463_v30 }
 0x38a   : > { %1537 = vrot.lane.b32.xlu1 %v1479_v52, %s3722_s29  ;;  %3173 = vmatmul.mubr.msk.f32.vlgmr.msra.gmra.mxu0 %vm1562_vm11, %v4185_v31  ;;  %v1488_v1 = vrot.slane %v1480_v49, %v4171_v23  ;;  %v1433_v52 = vcombine.high %v1429_v45, %v3714_v0  ;;  %s3732_s29 = smov 112  }
 0x38b   : > { %3174 = vmatmul.mubr.msk.f32.vlgmr.msra.gmra.mxu1 %vm1562_vm11, %v4185_v31  ;;  %2202 = vmatpush1.msra.mxu0 %v1725_v54  ;;  %v1711_v54 = vld [vmem:[#allocation7 + $0xf0] sm:$0xff] }
 0x38c   : > { %2273 = vmatpush1.msra.mxu1 %v1727_v55  ;;  %2203 = vmatprep.subr.mxu0 %v1694_v56  ;;  %v1495_v55 = vrot.slane %v1481_v51, %v4171_v23  ;;  %v1498_v56 = vcombine.high %v1488_v1, %v3714_v0 }
 0x38d   : > { %2274 = vmatprep.subr.mxu1 %v1696_v2  ;;  %1541 = vrot.lane.b32.xlu0 %v1497_v5, %s3723_s13  ;;  %s3733_s13 = smov 104  }
 0x38e   : > { %2204 = vmatpush1.msra.mxu0 %v1693_v8  ;;  %2275 = vmatpush1.msra.mxu1 %v1695_v10  ;;  %v1499_v23 = vcombine.high %v1495_v55, %v3714_v0 }
 0x38f   : > { %2237 = vmatprep.mubr.f32.mxu0 %v3714_v0  ;;  %2308 = vmatprep.mubr.f32.mxu1 %v3714_v0 }
 0x390   : > { %2343 = vmatprep.subr.mxu0 %v1730_v12  ;;  %2414 = vmatprep.subr.mxu1 %v1732_v17 }
 0x391   : > { %1505 = vrot.lane.b32.xlu1 %v1413_v19, %s3724_s15  ;;  %3175 = vmatmul.mubr.msk.f32.vlgmr.msra.gmra.mxu0 %vm1562_vm11, %v4185_v31  ;;  %s3734_s15 = smov 120  }
 0x392   : > { %3176 = vmatmul.mubr.msk.f32.vlgmr.msra.gmra.mxu1 %vm1562_vm11, %v4185_v31  ;;  %2344 = vmatpush1.msra.mxu0 %v1729_v33 }
 0x393   : > { %2415 = vmatpush1.msra.mxu1 %v1731_v20  ;;  %2345 = vmatprep.subr.mxu0 %v1698_v28 }
 0x394   : > { %2416 = vmatprep.subr.mxu1 %v1700_v62  ;;  %1501 = vrot.lane.b32.xlu0 %v1430_v26, %s3725_s24  ;;  %s2920_s24 = sand.u32 1, %s3819_s21  }
 0x395   : > { %2346 = vmatpush1.msra.mxu0 %v1697_v29  ;;  %2417 = vmatpush1.msra.mxu1 %v1699_v21 }
 0x396   : > { %2379 = vmatprep.mubr.f32.mxu0 %v3714_v0  ;;  %2450 = vmatprep.mubr.f32.mxu1 %v3714_v0 }
 0x397   : > { %2485 = vmatprep.subr.mxu0 %v1734_v15  ;;  %2556 = vmatprep.subr.mxu1 %v1736_v38 }
 0x398   : > { %1513 = vrot.lane.b32.xlu1 %v1422_v16, %s3726_s30  ;;  %3177 = vmatmul.mubr.msk.f32.vlgmr.msra.gmra.mxu0 %vm1562_vm11, %v4185_v31  ;;  %s3189_s30 = sshll.u32 %s3819_s21, 7 }
 0x399   : > { %3178 = vmatmul.mubr.msk.f32.vlgmr.msra.gmra.mxu1 %vm1562_vm11, %v4185_v31  ;;  %2486 = vmatpush1.msra.mxu0 %v1733_v24 }
 0x39a   : > { %2557 = vmatpush1.msra.mxu1 %v1735_v40  ;;  %2487 = vmatprep.subr.mxu0 %v1702_v3 }
 0x39b   : > { %2558 = vmatprep.subr.mxu1 %v1704_v42  ;;  %1509 = vrot.lane.b32.xlu0 %v1431_v27, %s3727_s14 }
 0x39c   : > { %2488 = vmatpush1.msra.mxu0 %v1701_v44  ;;  %2559 = vmatpush1.msra.mxu1 %v1703_v6 }
 0x39d   : > { %2521 = vmatprep.mubr.f32.mxu0 %v3714_v0  ;;  %2592 = vmatprep.mubr.f32.mxu1 %v3714_v0 }
 0x39e   : > { %2627 = vmatprep.subr.mxu0 %v1738_v9  ;;  %2698 = vmatprep.subr.mxu1 %v1740_v4 }
 0x39f   : > { %1521 = vrot.lane.b32.xlu1 %v1429_v45, %s3728_s25  ;;  %3179 = vmatmul.mubr.msk.f32.vlgmr.msra.gmra.mxu0 %vm1562_vm11, %v4185_v31 }
 0x3a0   : > { %3180 = vmatmul.mubr.msk.f32.vlgmr.msra.gmra.mxu1 %vm1562_vm11, %v4185_v31  ;;  %2628 = vmatpush1.msra.mxu0 %v1737_v60 }
 0x3a1   : > { %2699 = vmatpush1.msra.mxu1 %v1739_v47  ;;  %2629 = vmatprep.subr.mxu0 %v1706_v14 }
 0x3a2   : > { %2700 = vmatprep.subr.mxu1 %v1708_v48  ;;  %1517 = vrot.lane.b32.xlu0 %v1432_v35, %s3729_s26  ;;  %s2950_s26 = scalar_lea.hbm %s4417_s10, %s3189_s30 }
 0x3a3   : > { %2630 = vmatpush1.msra.mxu0 %v1705_v36  ;;  %2701 = vmatpush1.msra.mxu1 %v1707_v43 }
 0x3a4   : > { %2663 = vmatprep.mubr.f32.mxu0 %v3714_v0  ;;  %2734 = vmatprep.mubr.f32.mxu1 %v3714_v0 }
 0x3a5   : > { %2769 = vmatprep.subr.mxu0 %v1742_v25  ;;  %2840 = vmatprep.subr.mxu1 %v1744_v63 }
 0x3a6   : > { %1545 = vrot.lane.b32.xlu1 %v1488_v1, %s3730_s16  ;;  %3181 = vmatmul.mubr.msk.f32.vlgmr.msra.gmra.mxu0 %vm1562_vm11, %v4185_v31  ;;  %s2952_s16 = sshll.u32 %s4193_s12, 4  ;;  %s2953_s16 = int_to_ptr.vmem [resolvable:$true] %s2952_s16 }
 0x3a7   : > { %3182 = vmatmul.mubr.msk.f32.vlgmr.msra.gmra.mxu1 %vm1562_vm11, %v4185_v31  ;;  %2770 = vmatpush1.msra.mxu0 %v1741_v39 }
 0x3a8   : > { %2841 = vmatpush1.msra.mxu1 %v1743_v13  ;;  %2771 = vmatprep.subr.mxu0 %v1710_v50 }
 0x3a9   : > { %2842 = vmatprep.subr.mxu1 %v1712_v46  ;;  %1525 = vrot.lane.b32.xlu0 %v1433_v52, %s3731_s19  ;;  %s4286_s19 = scalar_lea.sflag [#allocation10], %s2920_s24 }
 0x3aa   : > { %2772 = vmatpush1.msra.mxu0 %v1709_v53  ;;  %2843 = vmatpush1.msra.mxu1 %v1711_v54 }
 0x3ab   : > { %2805 = vmatprep.mubr.f32.mxu0 %v3714_v0  ;;  %2876 = vmatprep.mubr.f32.mxu1 %v3714_v0 }
 0x3ac   : > { %1553 = vrot.lane.b32.xlu1 %v1495_v55, %s3732_s29  ;;  %3183 = vmatmul.mubr.msk.f32.vlgmr.msra.gmra.mxu0 %vm1562_vm11, %v4185_v31  ;;  %s3581_s29 = scalar_lea.vmem %s2953_s16, 128 }
 0x3ad   : > { %3184 = vmatmul.mubr.msk.f32.vlgmr.msra.gmra.mxu1 %vm1562_vm11, %v4185_v31  ;;  %1549 = vrot.lane.b32.xlu0 %v1498_v56, %s3733_s13  ;;  %p3582_p10 = scmp.ne.s32.totalorder %s2953_s16, %s3581_s29  ;;  %s3735_s13 = smov [#allocation9]  }
 0x3ae   : > { %s3585_s0 = sshll.u32 %s3735_s13, 4  ;;  %s3586_s0 = int_to_ptr.vmem [resolvable:$false] %s3585_s0 }
 0x3af   : > { %p3583_p2 = pnand %p3582_p10, %p4437_p12  ;;  %s3587_s1 = scalar_lea.vmem %s3586_s0, 256 }
 0x3b0   : > { %p3588_p7 = scmp.lt.s32.totalorder %s2953_s16, %s3586_s0  ;;  %p3589_p8 = scmp.lt.s32.totalorder %s3587_s1, %s3581_s29 }
 0x3b1   : > { %1557 = vrot.lane.b32.xlu0 %v1499_v23, %s3734_s15  ;;  %p3584_p4 = pneg %p3583_p2 }
 0x3b2   : > { %p3590_p11 = por %p3589_p8, %p3588_p7 }
 0x3b4   : > { %p3591_p0 = pnand %p3590_p11, %p3584_p4 }
 0x3b6   : > { %3594 = shalt.err (!%p3591_p0)
}
 0x3b7   : > { %s3595_s15 = scalar_lea.hbm %s2950_s26, 128  ;;  %s3599_s30 = scalar_lea.hbm %s4417_s10, 256 }
 0x3b8   : > { %p3596_p6 = scmp.ne.s32.totalorder %s2950_s26, %s3595_s15  ;;  %p3600_p5 = scmp.lt.s32.totalorder %s2950_s26, %s4417_s10 }
 0x3b9   : > { %p3601_p1 = scmp.lt.s32.totalorder %s3599_s30, %s3595_s15 }
 0x3ba   : > { %p3597_p9 = pnand %p3596_p6, %p4437_p12 }
 0x3bb   : > { %p3602_p3 = por %p3601_p1, %p3600_p5 }
 0x3bc   : > { %p3598_p13 = pneg %p3597_p9 }
 0x3be   : > { %p3603_p10 = pnand %p3602_p3, %p3598_p13 }
 0x3c0   : > { %3606 = shalt.err (!%p3603_p10)
}
 0x3c1   : > { %3369 = dma.vmem_to_hbm [thread:$0]  (%p4437_p12), %s2953_s16, 128, %s2950_s26, %s4286_s19   ;;  %vm1560_vm12 = vcmask 64512   ;;  %vm1564_vm13 = vcmask 195584   ;;  %vm1567_vm14 = vcmask 326656   ;;  %vm1569_vm15 = vcmask 392192  }
 0x3c2   : > { %vm1571_vm0 = vcmask 457728   ;;  %vm1574_vm3 = vcmask 588800   ;;  %vm1576_vm4 = vcmask 654336   ;;  %s3127_s0 = sshll.u32 %s4141_s22, 1  ;;  %vm1578_vm5 = vcmask 719872   ;;  %s3188_s1 = sshll.u32 %s3819_s21, 5 }
 0x3c3   : > { %vm1580_vm6 = vcmask 785408   ;;  %vm1582_vm7 = vcmask 850944   ;;  %s425_s26 = scalar_lea.vmem [#allocation8], %s3127_s0  ;;  %vm1586_vm8 = vcmask 982016   ;;  %s4310_s15 = scalar_lea.hbm %s4416_s9, %s3188_s1 }
 0x3c4   : > { %s2939_s16 = sshll.u32 %s425_s26, 4  ;;  %s2916_s12 = scalar_lea.sflag [#allocation4], %s4141_s22  ;;  %s2940_s16 = int_to_ptr.vmem [resolvable:$true] %s2939_s16 }
 0x3c5   : > { %s3607_s24 = scalar_lea.vmem %s2940_s16, 32  ;;  %s3736_s30 = smov [#allocation8]  }
 0x3c6   : > { %p3608_p2 = scmp.ne.s32.totalorder %s2940_s16, %s3607_s24  ;;  %s3611_s14 = sshll.u32 %s3736_s30, 4  ;;  %s3612_s14 = int_to_ptr.vmem [resolvable:$false] %s3611_s14 }
 0x3c7   : > { %s3613_s25 = scalar_lea.vmem %s3612_s14, 64  ;;  %p3614_p8 = scmp.lt.s32.totalorder %s2940_s16, %s3612_s14 }
 0x3c8   : > { %p3609_p4 = pnand %p3608_p2, %p4437_p12  ;;  %p3615_p11 = scmp.lt.s32.totalorder %s3613_s25, %s3607_s24 }
 0x3ca   : > { %p3610_p7 = pneg %p3609_p4  ;;  %p3616_p0 = por %p3615_p11, %p3614_p8 }
 0x3cc   : > { %p3617_p6 = pnand %p3616_p0, %p3610_p7 }
 0x3f5   : > { %v1530_v31 = vpop.permute.xlu1 %1529 }
 0x3f8   : > { %v1534_v0 = vpop.permute.xlu0 %1533 }
 0x3fc   : > { %v1538_v58 = vpop.permute.xlu1 %1537 }
 0x3ff   : > { %v1542_v57 = vpop.permute.xlu0 %1541 }
 0x403   : > { %v1506_v5 = vpop.permute.xlu1 %1505 }
 0x406   : > { %v1502_v2 = vpop.permute.xlu0 %1501 }
 0x407   : > { %v1561_v10 = vsel %vm1560_vm12, %v4227_v18, %v1502_v2 }
 0x408   : > { %v1563_v59 = vsel %vm1562_vm11, %v1561_v10, %v1506_v5 }
 0x40a   : > { %v1514_v11 = vpop.permute.xlu1 %1513 }
 0x40d   : > { %v1510_v8 = vpop.permute.xlu0 %1509 }
 0x40e   : > { %v1565_v12 = vsel %vm1564_vm13, %v1563_v59, %v1510_v8 }
 0x40f   : > { %v1566_v19 = vsel %vm450_vm1, %v1565_v12, %v1514_v11  ;;  %vm1584_vm1 = vcmask 916480  }
 0x411   : > { %v1522_v22 = vpop.permute.xlu1 %1521 }
 0x414   : > { %v1518_v17 = vpop.permute.xlu0 %1517 }
 0x415   : > { %v1568_v33 = vsel %vm1567_vm14, %v1566_v19, %v1518_v17 }
 0x416   : > { %v1570_v34 = vsel %vm1569_vm15, %v1568_v33, %v1522_v22 }
 0x418   : > { %v1546_v28 = vpop.permute.xlu1 %1545 }
 0x41b   : > { %v1526_v20 = vpop.permute.xlu0 %1525 }
 0x41c   : > { %v1572_v18 = vsel %vm1571_vm0, %v1570_v34, %v1526_v20 }
 0x41d   : > { %v1573_v62 = vsel %vm750_vm2, %v1572_v18, %v1530_v31 }
 0x41e   : > { %v1575_v26 = vsel %vm1574_vm3, %v1573_v62, %v1534_v0  ;;  %v1554_v38 = vpop.permute.xlu1 %1553 }
 0x41f   : > { %v1577_v29 = vsel %vm1576_vm4, %v1575_v26, %v1538_v58  ;;  %v1550_v21 = vpop.permute.xlu0 %1549 }
 0x420   : > { %v1579_v37 = vsel %vm1578_vm5, %v1577_v29, %v1542_v57 }
 0x421   : > { %v1581_v15 = vsel %vm1580_vm6, %v1579_v37, %v1546_v28 }
 0x422   : > { %v1583_v16 = vsel %vm1582_vm7, %v1581_v15, %v1550_v21 }
 0x423   : > { %v1585_v24 = vsel %vm1584_vm1, %v1583_v16, %v1554_v38  ;;  %v1558_v40 = vpop.permute.xlu0 %1557 }
 0x424   : > { %v1587_v3 = vsel %vm1586_vm8, %v1585_v24, %v1558_v40 }
 0x425   : > { %1588 = vst [vmem:[%s425_s26] sm:$0x3] %v1587_v3 }
 0x426   : > { %3620 = shalt.err (!%p3617_p6)
}
 0x427   : > { %s3621_s0 = scalar_lea.hbm %s4310_s15, 32  ;;  %s3625_s29 = scalar_lea.hbm %s4416_s9, 64 }
 0x428   : > { %p3622_p9 = scmp.ne.s32.totalorder %s4310_s15, %s3621_s0  ;;  %p3626_p1 = scmp.lt.s32.totalorder %s4310_s15, %s4416_s9 }
 0x429   : > { %p3627_p3 = scmp.lt.s32.totalorder %s3625_s29, %s3621_s0 }
 0x42a   : > { %p3623_p13 = pnand %p3622_p9, %p4437_p12 }
 0x42b   : > { %p3628_p10 = por %p3627_p3, %p3626_p1 }
 0x42c   : > { %p3624_p5 = pneg %p3623_p13 }
 0x42e   : > { %p3629_p2 = pnand %p3628_p10, %p3624_p5 }
 0x430   : > { %3632 = shalt.err (!%p3629_p2)
}
 0x431   : > { %3368 = dma.vmem_to_hbm [thread:$0]  (%p4437_p12), %s2940_s16, 32, %s4310_s15, %s2916_s12  }
 0x432   : > { %s3129_s24 = sshll.u32 %s4141_s22, 8  ;;  %s3194_s22 = sshll.u32 %s3819_s21, 12 }
 0x433   : > { %s4330_s14 = scalar_lea.vmem [#allocation11], %s3129_s24  ;;  %s4367_s25 = scalar_lea.hbm %s4418_s11, %s3194_s22 }
 0x434   : > { %s2966_s16 = sshll.u32 %s4330_s14, 4  ;;  %s3737_s21 = smov [#allocation11]   ;;  %s2967_s16 = int_to_ptr.vmem [resolvable:$true] %s2966_s16 }
 0x435   : > { %s3633_s0 = scalar_lea.vmem %s2967_s16, 4096  ;;  %s3637_s1 = sshll.u32 %s3737_s21, 4  ;;  %s3638_s1 = int_to_ptr.vmem [resolvable:$false] %s3637_s1 }
 0x436   : > { %p3634_p4 = scmp.ne.s32.totalorder %s2967_s16, %s3633_s0  ;;  %s3639_s26 = scalar_lea.vmem %s3638_s1, 8192 }
 0x437   : > { %p3640_p11 = scmp.lt.s32.totalorder %s2967_s16, %s3638_s1  ;;  %p3641_p0 = scmp.lt.s32.totalorder %s3639_s26, %s3633_s0 }
 0x438   : > { %p3635_p7 = pnand %p3634_p4, %p4437_p12 }
 0x439   : > { %p3642_p6 = por %p3641_p0, %p3640_p11 }
 0x43a   : > { %p3636_p8 = pneg %p3635_p7 }
 0x43c   : > { %p3643_p9 = pnand %p3642_p6, %p3636_p8 }
 0x43d   : > { %v1813_v61 = vpop.f32.mrf.mxu0  ;;  %v1884_v42 = vpop.f32.mrf.mxu1 }
 0x43e   : > { %2883 = vst [vmem:[%s4330_s14] sm:$0xff] %v1813_v61  ;;  %2885 = vst [vmem:[%s4330_s14 + $0x10] sm:$0xff] %v1884_v42 }
 0x43f   : > { %v1815_v27 = vpop.f32.mrf.mxu0  ;;  %v1886_v44 = vpop.f32.mrf.mxu1 }
 0x440   : > { %2884 = vst [vmem:[%s4330_s14 + $0x8] sm:$0xff] %v1815_v27  ;;  %2886 = vst [vmem:[%s4330_s14 + $0x18] sm:$0xff] %v1886_v44 }
 0x443   : > { %v1955_v6 = vpop.f32.mrf.mxu0 }
 0x444   : > { %2887 = vst [vmem:[%s4330_s14 + $0x20] sm:$0xff] %v1955_v6  ;;  %v2026_v7 = vpop.f32.mrf.mxu1 }
 0x445   : > { %2889 = vst [vmem:[%s4330_s14 + $0x30] sm:$0xff] %v2026_v7  ;;  %v1957_v32 = vpop.f32.mrf.mxu0 }
 0x446   : > { %2888 = vst [vmem:[%s4330_s14 + $0x28] sm:$0xff] %v1957_v32  ;;  %v2028_v9 = vpop.f32.mrf.mxu1 }
 0x447   : > { %2890 = vst [vmem:[%s4330_s14 + $0x38] sm:$0xff] %v2028_v9 }
 0x44a   : > { %v2097_v4 = vpop.f32.mrf.mxu0 }
 0x44b   : > { %2891 = vst [vmem:[%s4330_s14 + $0x40] sm:$0xff] %v2097_v4  ;;  %v2168_v30 = vpop.f32.mrf.mxu1 }
 0x44c   : > { %2893 = vst [vmem:[%s4330_s14 + $0x50] sm:$0xff] %v2168_v30  ;;  %v2099_v45 = vpop.f32.mrf.mxu0 }
 0x44d   : > { %2892 = vst [vmem:[%s4330_s14 + $0x48] sm:$0xff] %v2099_v45  ;;  %v2170_v60 = vpop.f32.mrf.mxu1 }
 0x44e   : > { %2894 = vst [vmem:[%s4330_s14 + $0x58] sm:$0xff] %v2170_v60 }
 0x451   : > { %v2239_v41 = vpop.f32.mrf.mxu0 }
 0x452   : > { %2895 = vst [vmem:[%s4330_s14 + $0x60] sm:$0xff] %v2239_v41  ;;  %v2310_v47 = vpop.f32.mrf.mxu1 }
 0x453   : > { %2897 = vst [vmem:[%s4330_s14 + $0x70] sm:$0xff] %v2310_v47  ;;  %v2241_v14 = vpop.f32.mrf.mxu0 }
 0x454   : > { %2896 = vst [vmem:[%s4330_s14 + $0x68] sm:$0xff] %v2241_v14  ;;  %v2312_v48 = vpop.f32.mrf.mxu1 }
 0x455   : > { %2898 = vst [vmem:[%s4330_s14 + $0x78] sm:$0xff] %v2312_v48 }
 0x458   : > { %v2381_v35 = vpop.f32.mrf.mxu0 }
 0x459   : > { %2899 = vst [vmem:[%s4330_s14 + $0x80] sm:$0xff] %v2381_v35  ;;  %v2452_v36 = vpop.f32.mrf.mxu1 }
 0x45a   : > { %2901 = vst [vmem:[%s4330_s14 + $0x90] sm:$0xff] %v2452_v36  ;;  %v2383_v43 = vpop.f32.mrf.mxu0 }
 0x45b   : > { %2900 = vst [vmem:[%s4330_s14 + $0x88] sm:$0xff] %v2383_v43  ;;  %v2454_v49 = vpop.f32.mrf.mxu1 }
 0x45c   : > { %2902 = vst [vmem:[%s4330_s14 + $0x98] sm:$0xff] %v2454_v49 }
 0x45f   : > { %v2523_v25 = vpop.f32.mrf.mxu0 }
 0x460   : > { %2903 = vst [vmem:[%s4330_s14 + $0xa0] sm:$0xff] %v2523_v25  ;;  %v2594_v63 = vpop.f32.mrf.mxu1 }
 0x461   : > { %2905 = vst [vmem:[%s4330_s14 + $0xb0] sm:$0xff] %v2594_v63  ;;  %v2525_v1 = vpop.f32.mrf.mxu0 }
 0x462   : > { %2904 = vst [vmem:[%s4330_s14 + $0xa8] sm:$0xff] %v2525_v1  ;;  %v2596_v39 = vpop.f32.mrf.mxu1 }
 0x463   : > { %2906 = vst [vmem:[%s4330_s14 + $0xb8] sm:$0xff] %v2596_v39 }
 0x466   : > { %v2665_v13 = vpop.f32.mrf.mxu0 }
 0x467   : > { %2907 = vst [vmem:[%s4330_s14 + $0xc0] sm:$0xff] %v2665_v13  ;;  %v2736_v50 = vpop.f32.mrf.mxu1 }
 0x468   : > { %2909 = vst [vmem:[%s4330_s14 + $0xd0] sm:$0xff] %v2736_v50  ;;  %v2667_v46 = vpop.f32.mrf.mxu0 }
 0x469   : > { %2908 = vst [vmem:[%s4330_s14 + $0xc8] sm:$0xff] %v2667_v46  ;;  %v2738_v51 = vpop.f32.mrf.mxu1 }
 0x46a   : > { %2910 = vst [vmem:[%s4330_s14 + $0xd8] sm:$0xff] %v2738_v51 }
 0x46c   : > { %v2807_v52 = vpop.f32.mrf.mxu0 }
 0x46d   : > { %2911 = vst [vmem:[%s4330_s14 + $0xe0] sm:$0xff] %v2807_v52  ;;  %v2878_v53 = vpop.f32.mrf.mxu1 }
 0x46e   : > { %2913 = vst [vmem:[%s4330_s14 + $0xf0] sm:$0xff] %v2878_v53  ;;  %v2809_v54 = vpop.f32.mrf.mxu0 }
 0x46f   : > { %2912 = vst [vmem:[%s4330_s14 + $0xe8] sm:$0xff] %v2809_v54  ;;  %v2880_v55 = vpop.f32.mrf.mxu1 }
 0x470   : > { %2914 = vst [vmem:[%s4330_s14 + $0xf8] sm:$0xff] %v2880_v55 }
 0x471   : > { %3646 = shalt.err (!%p3643_p9)
}
 0x472   : > { %s3647_s29 = scalar_lea.hbm %s4367_s25, 4096  ;;  %s3651_s24 = scalar_lea.hbm %s4418_s11, 8192 }
 0x473   : > { %p3648_p13 = scmp.ne.s32.totalorder %s4367_s25, %s3647_s29  ;;  %p3652_p3 = scmp.lt.s32.totalorder %s4367_s25, %s4418_s11 }
 0x474   : > { %p3653_p10 = scmp.lt.s32.totalorder %s3651_s24, %s3647_s29 }
 0x475   : > { %p3649_p5 = pnand %p3648_p13, %p4437_p12 }
 0x476   : > { %p3654_p2 = por %p3653_p10, %p3652_p3 }
 0x477   : > { %p3650_p1 = pneg %p3649_p5 }
 0x479   : > { %p3655_p4 = pnand %p3654_p2, %p3650_p1 }
 0x47b   : > { %3658 = shalt.err (!%p3655_p4)
}
 0x47c   : > { %3370 = dma.vmem_to_hbm [thread:$0]  (%p4437_p12), %s2967_s16, 4096, %s4367_s25, %s4286_s19  }
 0x47d PF: > { %p3400_p7 = scmp.ge.s32.totalorder %s3705_s20, 2  ;;  %s2978_s15 = sand.u32 1, %s3693_s17  }
 0x47e   : > { %p4438_p8 = scmp.ne.s32.totalorder %s4428_s28, 0  ;;  %s2979_s12 = scalar_lea.sflag [#allocation4], %s2978_s15 }
 0x480   : > { %p3385_p11 = pnand %p3400_p7, %p4438_p8 }
 0x482   : > { %p3386_p0 = pneg %p3385_p11 }
 0x484   : > { %3684 = dma.done.wait (%p3386_p0), %s2979_s12, 32  }
 0x485   : > { %3686 = vsyncadd (%p3386_p0), %s2979_s12, 4294967264  ;;  %s4439_s0 = sadd.s32 4294967294, %s3705_s20  }
 0x486   : > { %s2987_s21 = sand.u32 1, %s4439_s0  }
 0x487   : > { %s2988_s1 = scalar_lea.sflag [#allocation10], %s2987_s21 }
 0x488   : > { %3688 = dma.done.wait (%p3386_p0), %s2988_s1, 4224  }
 0x489   : > { %3690 = vsyncadd (%p3386_p0), %s2988_s1, 4294963072  ;;  %s4440_s27 = sld [smem:[#allocation16_spill]]  ;;  %p27_p12 = scmp.ge.s32.totalorder %s3823_s23, 4  }
 0x48a   : > { %s4441_s19 = sld [smem:[#allocation17_spill]]  ;;  %s4442_s17 = smov %s3697_s18 }
 0x48b   : > { %s4444_s20 = smov %s3823_s23  ;;  %29 = sbr.rel (!%p27_p12) target bundleno = 10 (0xa), region = 136 }
 0x48f   : > { %s4443_s18 = smov %s4440_s27 }
 0x490   :  { %3002 = vsyncpa [#allocation3], 1 }
 0x491   :  { %3004 = vsyncpa [#allocation3 + $0x1], 1 }
 0x492   :  { %3005 = vsyncpa [#allocation6], 1 }
 0x493   :  { %3006 = vsyncpa [#allocation4], 1 }
 0x494   :  { %3008 = vsyncpa [#allocation4 + $0x1], 1 }
 0x495   :  { %3009 = vsyncpa [#allocation10], 1 }
 0x496   :  { %3011 = vsyncpa [#allocation10 + $0x1], 1 }

</bundles_post_ra>
